<compile_context>
chip_gen: v5e
topology: v5e:2x2
jax: 0.10.0
libtpu: 0.0.40
codegen_flags: <defaults>
</compile_context>

<pallas_src>
import functools

import jax
import jax.numpy as jnp
import numpy as np
from jax.experimental import pallas as pl
from jax.experimental.pallas import tpu as pltpu


def _preproc_kernel(sel_ref, pool_ref, x_ref, oth_ref, o_ref, *, crop, cs, oc):
    """Space2depth + center-crop + 2x2 avg-pool + other-channel copy for one slab block.

    sel_ref  : (W, 2*crop)    one-hot W-selection columns, ordered (j, x)
    pool_ref : (W, 2*(W//4))  0.5-weighted W-pooling columns, ordered (j, x)
    x_ref    : (n_blk, cs, H, W)                satellite channels only
    oth_ref  : (n_blk, C-cs, crop, crop)        pre-cropped non-sat channels
    o_ref    : (n_blk, 8*cs + (C-cs), crop, crop)  final torch channel order
    """
    n_blk = x_ref.shape[0]
    h, w = x_ref.shape[2], x_ref.shape[3]
    hq = h // 4
    rows = n_blk * cs * crop
    f32 = jnp.float32
    prec = jax.lax.Precision.HIGHEST   # RHS is exactly {0,1,0.5}; MXU is idle anyway

    s_sel = sel_ref[...]               # (w, 2*crop)
    s_pool = pool_ref[...]             # (w, 2*(w//4))

    def store(res, part):
        # res: (2, n_blk, cs, crop, 2*crop), lanes = (j, x).  Write each small piece
        # straight to its output channel (torch order part*4*cs + c*4 + i*2 + j) as it
        # is produced -> only one (crop, crop) piece live at a time, no big concat.
        for i in range(2):
            for j in range(2):
                piece = res[i, :, :, :, j * crop:(j + 1) * crop]   # (n_blk, cs, crop, crop)
                for c in range(cs):
                    o_ref[:, part * 4 * cs + c * 4 + i * 2 + j, :, :] = piece[:, c, :, :]

    # ---- center crop of space2depth(sat): ctr[i,j][y,x] = sat[2*(oc+y)+i, 2*(oc+x)+j]
    # H parity i -> stride-2 sublane ref load of only the cropped rows, both parities
    # stacked along M -> one MXU selection matmul; W offset j rides the RHS columns.
    crop_lhs = jnp.concatenate(
        [x_ref[:, :, pl.ds(2 * oc + i, crop, 2), :].reshape(rows, w) for i in range(2)],
        axis=0)
    crop_res = jnp.dot(crop_lhs, s_sel, preferred_element_type=f32, precision=prec)
    store(crop_res.reshape(2, n_blk, cs, crop, 2 * crop), part=0)

    # ---- 2x2 average pool of space2depth(sat) (== F.avg_pool3d(., (1, 2, 2))):
    # H pairs averaged from stride-4 ref loads, W pairs averaged by the pooling matmul.
    pool_lhs = jnp.concatenate(
        [((x_ref[:, :, pl.ds(i, hq, 4), :] + x_ref[:, :, pl.ds(i + 2, hq, 4), :]) * 0.5
          ).reshape(n_blk * cs * hq, w) for i in range(2)],
        axis=0)
    pool_res = jnp.dot(pool_lhs, s_pool, preferred_element_type=f32, precision=prec)
    store(pool_res.reshape(2, n_blk, cs, hq, 2 * (w // 4)), part=1)

    # ---- non-satellite channels: already center-cropped by the wrapper; plain copy,
    # so the final channel concat never materializes outside this kernel.
    o_ref[:, 8 * cs:, :, :] = oth_ref[...]


def _metnet_preprocessor(x, *, sat_channels=4, crop_size=16, slabs_per_step=None):
    """Pallas equivalent of MetNetPreprocessor(split_input=True, use_space2depth=True)."""
    b, t, c, h, w = x.shape
    cs = sat_channels
    assert x.dtype == jnp.float32
    assert c > cs, "split_input=True needs extra (non-sat) channels"
    assert h == w and h % 8 == 0
    # The torch module's concat only type-checks when crop_size == H // 4.
    assert crop_size == h // 4, "concat requires crop_size == H // 4"
    crop = crop_size
    n = b * t
    wq = w // 4
    oc = (h // 2 - crop) // 2                        # crop offset inside the s2d output
    oo = (h - h // 2) // 2 + (h // 2 - crop) // 2    # composed crop offset for "other"
    co = 8 * cs + (c - cs)

    # --- slabs per grid step -------------------------------------------------------
    # ~<=2 MiB of satellite input per step, >= 8 steps when possible, prefer an even
    # step count (v7x two-core balance); restricted to divisors of n so blocks always
    # tile exactly (no tail masking / input padding needed).
    if slabs_per_step is None:
        per_slab = cs * h * w * 4
        cap = max(1, (2 << 20) // per_slab)
        cap = min(cap, max(1, n // 8))
        divs = [d for d in range(1, min(cap, n) + 1) if n % d == 0]
        even = [d for d in divs if (n // d) % 2 == 0]
        slabs_per_step = max(even) if even else max(divs)
    assert n % slabs_per_step == 0
    num_steps = n // slabs_per_step

    # Constant W-selection / W-pooling matrices (columns ordered (j, x)), hoisted out of
    # the kernel body and kept VMEM-resident across all grid steps.
    wi = np.arange(w)[:, None]
    k = np.arange(crop)[None, :]
    sel_np = np.concatenate(
        [(wi == 2 * (oc + k) + j).astype(np.float32) for j in (0, 1)], axis=1)
    xq = np.arange(wq)[None, :]
    pool_np = np.concatenate(
        [0.5 * ((wi == 4 * xq + j) | (wi == 4 * xq + 2 + j)).astype(np.float32)
         for j in (0, 1)], axis=1)
    sel = jnp.asarray(sel_np)        # (w, 2*crop)
    pool = jnp.asarray(pool_np)      # (w, 2*wq)

    # Free reshape; the channel-blocked BlockSpec only ever DMAs the first `cs`
    # (satellite) channels.  The "other" channels enter only as their crop window.
    x_flat = x.reshape(n, c, h, w)
    other = x[:, :, cs:, oo:oo + crop, oo:oo + crop].reshape(n, c - cs, crop, crop)

    blk_x = slabs_per_step * cs * h * w * 4
    blk_oth = slabs_per_step * (c - cs) * crop * crop * 4
    blk_out = slabs_per_step * co * crop * crop * 4
    consts = int(sel.size + pool.size) * 4
    needed = 2 * (blk_x + blk_oth + blk_out) + 2 * consts + (4 << 20)
    try:  # generation-aware VMEM ceiling (v5e/v6e: 128 MiB, v7x: 64 MiB)
        vmem_cap = int(pltpu.get_tpu_info().vmem_capacity_bytes)
    except Exception:
        vmem_cap = 64 << 20
    vmem_limit = int(min(vmem_cap * 3 // 4, max(32 << 20, needed)))

    kernel = functools.partial(_preproc_kernel, crop=crop, cs=cs, oc=oc)
    out = pl.pallas_call(
        kernel,
        out_shape=jax.ShapeDtypeStruct((n, co, crop, crop), jnp.float32),
        grid=(num_steps,),
        in_specs=[
            pl.BlockSpec((w, 2 * crop), lambda g: (0, 0)),     # constant, resident
            pl.BlockSpec((w, 2 * wq), lambda g: (0, 0)),       # constant, resident
            pl.BlockSpec((slabs_per_step, cs, h, w), lambda g: (g, 0, 0, 0)),
            pl.BlockSpec((slabs_per_step, c - cs, crop, crop), lambda g: (g, 0, 0, 0)),
        ],
        out_specs=pl.BlockSpec((slabs_per_step, co, crop, crop),
                               lambda g: (g, 0, 0, 0)),
        compiler_params=pltpu.CompilerParams(
            dimension_semantics=("parallel",),
            vmem_limit_bytes=vmem_limit),
    )(sel, pool, x_flat, other)

    # Channel order is already the torch order ([ctr c*4+i*2+j] ++ [pool ...] ++ other),
    # so the wrapper's only post-work is a free reshape — no transpose, no concat.
    return out.reshape(b, t, co, crop, crop)


metnet_preprocessor = jax.jit(
    _metnet_preprocessor,
    static_argnames=("sat_channels", "crop_size", "slabs_per_step"))


def _center_crop(a, size):
    hh, ww = a.shape[-2], a.shape[-1]
    top = (hh - size) // 2
    left = (ww - size) // 2
    return a[..., top:top + size, left:left + size]


def _reference(x, sat_channels, crop_size):
    """Pure-JAX reference mirroring the torch forward pass."""
    b, t, c, h, w = x.shape
    sat = x[:, :, :sat_channels]
    other = x[:, :, sat_channels:]
    other = _center_crop(other, w // 2)
    other = _center_crop(other, crop_size)
    # PixelUnshuffle(2): out channel = c*4 + i*2 + j, (i, j) = (H offset, W offset)
    hh, wh = h // 2, w // 2
    d = sat.reshape(b, t, sat_channels, hh, 2, wh, 2)
    d = d.transpose(0, 1, 2, 4, 6, 3, 5).reshape(b, t, sat_channels * 4, hh, wh)
    sat_center = _center_crop(d, crop_size)
    sat_mean = d.reshape(b, t, sat_channels * 4, hh // 2, 2, wh // 2, 2).mean(axis=(4, 6))
    return jnp.concatenate([sat_center, sat_mean, other], axis=2)


if __name__ == "__main__":
    key = jax.random.PRNGKey(0)
    B, T, C, H, W = 2, 3, 6, 64, 64
    SAT, CROP = 4, 16

    x = jax.random.normal(key, (B, T, C, H, W), dtype=jnp.float32)

    out = metnet_preprocessor(x, sat_channels=SAT, crop_size=CROP)
    out = jax.block_until_ready(out)

    ref = _reference(x, SAT, CROP)
    assert out.shape == (B, T, 8 * SAT + (C - SAT), CROP, CROP), out.shape
    np.testing.assert_allclose(np.asarray(out), np.asarray(ref), rtol=1e-5, atol=1e-5)
    print("KERNEL_OK")
</pallas_src>

<mosaic_0001>
module attributes {stable_mosaic.version = 11 : i64} {
  func.func @_preproc_kernel(%arg0: i32, %arg1: memref<64x32xf32, #tpu.memory_space<vmem>>, %arg2: memref<64x32xf32, #tpu.memory_space<vmem>>, %arg3: memref<1x4x64x64xf32, #tpu.memory_space<vmem>>, %arg4: memref<1x2x16x16xf32, #tpu.memory_space<vmem>>, %arg5: memref<1x34x16x16xf32, #tpu.memory_space<vmem>>) attributes {dimension_semantics = [#tpu.dimension_semantics<parallel>], iteration_bounds = array<i64: 6>, scalar_prefetch = 0 : i64, scratch_operands = 0 : i64, tpu.core_type = #tpu.core_type<tc>, window_params = [{pipeline_mode = #tpu.pipeline_mode<synchronous>, transform_indices = @transform_0, window_bounds = array<i64: 64, 32>}, {pipeline_mode = #tpu.pipeline_mode<synchronous>, transform_indices = @transform_1, window_bounds = array<i64: 64, 32>}, {transform_indices = @transform_2, window_bounds = array<i64: 1, 4, 64, 64>}, {transform_indices = @transform_3, window_bounds = array<i64: 1, 2, 16, 16>}, {transform_indices = @transform_4, window_bounds = array<i64: 1, 34, 16, 16>}]} {
    %c0 = arith.constant 0 : index
    %c0_0 = arith.constant 0 : index
    %0 = vector.load %arg1[%c0, %c0_0] : memref<64x32xf32, #tpu.memory_space<vmem>>, vector<64x32xf32>
    %c0_1 = arith.constant 0 : index
    %c0_2 = arith.constant 0 : index
    %1 = vector.load %arg2[%c0_1, %c0_2] : memref<64x32xf32, #tpu.memory_space<vmem>>, vector<64x32xf32>
    %c0_3 = arith.constant 0 : index
    %c0_4 = arith.constant 0 : index
    %c16 = arith.constant 16 : index
    %c0_5 = arith.constant 0 : index
    %2 = tpu.strided_load %arg3[%c0_3, %c0_4, %c16, %c0_5] {strides = array<i32: 1, 1, 2, 1>} : memref<1x4x64x64xf32, #tpu.memory_space<vmem>>, vector<1x4x16x64xf32>
    %3 = vector.shape_cast %2 : vector<1x4x16x64xf32> to vector<64x64xf32>
    %c0_6 = arith.constant 0 : index
    %c0_7 = arith.constant 0 : index
    %c17 = arith.constant 17 : index
    %c0_8 = arith.constant 0 : index
    %4 = tpu.strided_load %arg3[%c0_6, %c0_7, %c17, %c0_8] {strides = array<i32: 1, 1, 2, 1>} : memref<1x4x64x64xf32, #tpu.memory_space<vmem>>, vector<1x4x16x64xf32>
    %5 = vector.shape_cast %4 : vector<1x4x16x64xf32> to vector<64x64xf32>
    %6 = tpu.concatenate %3, %5 in 0 : vector<64x64xf32>, vector<64x64xf32> -> vector<128x64xf32>
    %cst = arith.constant dense<0.000000e+00> : vector<128x32xf32>
    %7 = tpu.matmul %6, %0, %cst {dimension_numbers = #tpu.dot_dimension_numbers<[1], [0], [0], [1], [0, 0, 1, 1], [], []>, precision = #tpu.contract_precision<fp32>} : vector<128x64xf32>, vector<64x32xf32>, vector<128x32xf32> -> vector<128x32xf32>
    %8 = vector.shape_cast %7 : vector<128x32xf32> to vector<2x1x4x16x32xf32>
    %9 = vector.extract_strided_slice %8 {offsets = [0, 0, 0, 0, 0], sizes = [1, 1, 4, 16, 16], strides = [1, 1, 1, 1, 1]} : vector<2x1x4x16x32xf32> to vector<1x1x4x16x16xf32>
    %10 = vector.shape_cast %9 : vector<1x1x4x16x16xf32> to vector<1x4x16x16xf32>
    %11 = vector.extract_strided_slice %10 {offsets = [0, 0, 0, 0], sizes = [1, 1, 16, 16], strides = [1, 1, 1, 1]} : vector<1x4x16x16xf32> to vector<1x1x16x16xf32>
    %12 = vector.shape_cast %11 : vector<1x1x16x16xf32> to vector<1x16x16xf32>
    %c0_9 = arith.constant 0 : index
    %c0_10 = arith.constant 0 : index
    %c0_11 = arith.constant 0 : index
    %c0_12 = arith.constant 0 : index
    %13 = vector.load %arg5[%c0_9, %c0_10, %c0_11, %c0_12] : memref<1x34x16x16xf32, #tpu.memory_space<vmem>>, vector<1x1x16x16xf32>
    %14 = vector.shape_cast %13 : vector<1x1x16x16xf32> to vector<1x16x16xf32>
    %15 = vector.shape_cast %12 : vector<1x16x16xf32> to vector<1x1x16x16xf32>
    tpu.vector_store %arg5[%c0_9, %c0_10, %c0_11, %c0_12], %15 {strides = array<i32>} : memref<1x34x16x16xf32, #tpu.memory_space<vmem>>, vector<1x1x16x16xf32>,
    %16 = vector.extract_strided_slice %10 {offsets = [0, 1, 0, 0], sizes = [1, 1, 16, 16], strides = [1, 1, 1, 1]} : vector<1x4x16x16xf32> to vector<1x1x16x16xf32>
    %17 = vector.shape_cast %16 : vector<1x1x16x16xf32> to vector<1x16x16xf32>
    %c0_13 = arith.constant 0 : index
    %c4 = arith.constant 4 : index
    %c0_14 = arith.constant 0 : index
    %c0_15 = arith.constant 0 : index
    %18 = vector.load %arg5[%c0_13, %c4, %c0_14, %c0_15] : memref<1x34x16x16xf32, #tpu.memory_space<vmem>>, vector<1x1x16x16xf32>
    %19 = vector.shape_cast %18 : vector<1x1x16x16xf32> to vector<1x16x16xf32>
    %20 = vector.shape_cast %17 : vector<1x16x16xf32> to vector<1x1x16x16xf32>
    tpu.vector_store %arg5[%c0_13, %c4, %c0_14, %c0_15], %20 {strides = array<i32>} : memref<1x34x16x16xf32, #tpu.memory_space<vmem>>, vector<1x1x16x16xf32>,
    %21 = vector.extract_strided_slice %10 {offsets = [0, 2, 0, 0], sizes = [1, 1, 16, 16], strides = [1, 1, 1, 1]} : vector<1x4x16x16xf32> to vector<1x1x16x16xf32>
    %22 = vector.shape_cast %21 : vector<1x1x16x16xf32> to vector<1x16x16xf32>
    %c0_16 = arith.constant 0 : index
    %c8 = arith.constant 8 : index
    %c0_17 = arith.constant 0 : index
    %c0_18 = arith.constant 0 : index
    %23 = vector.load %arg5[%c0_16, %c8, %c0_17, %c0_18] : memref<1x34x16x16xf32, #tpu.memory_space<vmem>>, vector<1x1x16x16xf32>
    %24 = vector.shape_cast %23 : vector<1x1x16x16xf32> to vector<1x16x16xf32>
    %25 = vector.shape_cast %22 : vector<1x16x16xf32> to vector<1x1x16x16xf32>
    tpu.vector_store %arg5[%c0_16, %c8, %c0_17, %c0_18], %25 {strides = array<i32>} : memref<1x34x16x16xf32, #tpu.memory_space<vmem>>, vector<1x1x16x16xf32>,
    %26 = vector.extract_strided_slice %10 {offsets = [0, 3, 0, 0], sizes = [1, 1, 16, 16], strides = [1, 1, 1, 1]} : vector<1x4x16x16xf32> to vector<1x1x16x16xf32>
    %27 = vector.shape_cast %26 : vector<1x1x16x16xf32> to vector<1x16x16xf32>
    %c0_19 = arith.constant 0 : index
    %c12 = arith.constant 12 : index
    %c0_20 = arith.constant 0 : index
    %c0_21 = arith.constant 0 : index
    %28 = vector.load %arg5[%c0_19, %c12, %c0_20, %c0_21] : memref<1x34x16x16xf32, #tpu.memory_space<vmem>>, vector<1x1x16x16xf32>
    %29 = vector.shape_cast %28 : vector<1x1x16x16xf32> to vector<1x16x16xf32>
    %30 = vector.shape_cast %27 : vector<1x16x16xf32> to vector<1x1x16x16xf32>
    tpu.vector_store %arg5[%c0_19, %c12, %c0_20, %c0_21], %30 {strides = array<i32>} : memref<1x34x16x16xf32, #tpu.memory_space<vmem>>, vector<1x1x16x16xf32>,
    %31 = vector.extract_strided_slice %8 {offsets = [0, 0, 0, 0, 16], sizes = [1, 1, 4, 16, 16], strides = [1, 1, 1, 1, 1]} : vector<2x1x4x16x32xf32> to vector<1x1x4x16x16xf32>
    %32 = vector.shape_cast %31 : vector<1x1x4x16x16xf32> to vector<1x4x16x16xf32>
    %33 = vector.extract_strided_slice %32 {offsets = [0, 0, 0, 0], sizes = [1, 1, 16, 16], strides = [1, 1, 1, 1]} : vector<1x4x16x16xf32> to vector<1x1x16x16xf32>
    %34 = vector.shape_cast %33 : vector<1x1x16x16xf32> to vector<1x16x16xf32>
    %c0_22 = arith.constant 0 : index
    %c1 = arith.constant 1 : index
    %c0_23 = arith.constant 0 : index
    %c0_24 = arith.constant 0 : index
    %35 = vector.load %arg5[%c0_22, %c1, %c0_23, %c0_24] : memref<1x34x16x16xf32, #tpu.memory_space<vmem>>, vector<1x1x16x16xf32>
    %36 = vector.shape_cast %35 : vector<1x1x16x16xf32> to vector<1x16x16xf32>
    %37 = vector.shape_cast %34 : vector<1x16x16xf32> to vector<1x1x16x16xf32>
    tpu.vector_store %arg5[%c0_22, %c1, %c0_23, %c0_24], %37 {strides = array<i32>} : memref<1x34x16x16xf32, #tpu.memory_space<vmem>>, vector<1x1x16x16xf32>,
    %38 = vector.extract_strided_slice %32 {offsets = [0, 1, 0, 0], sizes = [1, 1, 16, 16], strides = [1, 1, 1, 1]} : vector<1x4x16x16xf32> to vector<1x1x16x16xf32>
    %39 = vector.shape_cast %38 : vector<1x1x16x16xf32> to vector<1x16x16xf32>
    %c0_25 = arith.constant 0 : index
    %c5 = arith.constant 5 : index
    %c0_26 = arith.constant 0 : index
    %c0_27 = arith.constant 0 : index
    %40 = vector.load %arg5[%c0_25, %c5, %c0_26, %c0_27] : memref<1x34x16x16xf32, #tpu.memory_space<vmem>>, vector<1x1x16x16xf32>
    %41 = vector.shape_cast %40 : vector<1x1x16x16xf32> to vector<1x16x16xf32>
    %42 = vector.shape_cast %39 : vector<1x16x16xf32> to vector<1x1x16x16xf32>
    tpu.vector_store %arg5[%c0_25, %c5, %c0_26, %c0_27], %42 {strides = array<i32>} : memref<1x34x16x16xf32, #tpu.memory_space<vmem>>, vector<1x1x16x16xf32>,
    %43 = vector.extract_strided_slice %32 {offsets = [0, 2, 0, 0], sizes = [1, 1, 16, 16], strides = [1, 1, 1, 1]} : vector<1x4x16x16xf32> to vector<1x1x16x16xf32>
    %44 = vector.shape_cast %43 : vector<1x1x16x16xf32> to vector<1x16x16xf32>
    %c0_28 = arith.constant 0 : index
    %c9 = arith.constant 9 : index
    %c0_29 = arith.constant 0 : index
    %c0_30 = arith.constant 0 : index
    %45 = vector.load %arg5[%c0_28, %c9, %c0_29, %c0_30] : memref<1x34x16x16xf32, #tpu.memory_space<vmem>>, vector<1x1x16x16xf32>
    %46 = vector.shape_cast %45 : vector<1x1x16x16xf32> to vector<1x16x16xf32>
    %47 = vector.shape_cast %44 : vector<1x16x16xf32> to vector<1x1x16x16xf32>
    tpu.vector_store %arg5[%c0_28, %c9, %c0_29, %c0_30], %47 {strides = array<i32>} : memref<1x34x16x16xf32, #tpu.memory_space<vmem>>, vector<1x1x16x16xf32>,
    %48 = vector.extract_strided_slice %32 {offsets = [0, 3, 0, 0], sizes = [1, 1, 16, 16], strides = [1, 1, 1, 1]} : vector<1x4x16x16xf32> to vector<1x1x16x16xf32>
    %49 = vector.shape_cast %48 : vector<1x1x16x16xf32> to vector<1x16x16xf32>
    %c0_31 = arith.constant 0 : index
    %c13 = arith.constant 13 : index
    %c0_32 = arith.constant 0 : index
    %c0_33 = arith.constant 0 : index
    %50 = vector.load %arg5[%c0_31, %c13, %c0_32, %c0_33] : memref<1x34x16x16xf32, #tpu.memory_space<vmem>>, vector<1x1x16x16xf32>
    %51 = vector.shape_cast %50 : vector<1x1x16x16xf32> to vector<1x16x16xf32>
    %52 = vector.shape_cast %49 : vector<1x16x16xf32> to vector<1x1x16x16xf32>
    tpu.vector_store %arg5[%c0_31, %c13, %c0_32, %c0_33], %52 {strides = array<i32>} : memref<1x34x16x16xf32, #tpu.memory_space<vmem>>, vector<1x1x16x16xf32>,
    %53 = vector.extract_strided_slice %8 {offsets = [1, 0, 0, 0, 0], sizes = [1, 1, 4, 16, 16], strides = [1, 1, 1, 1, 1]} : vector<2x1x4x16x32xf32> to vector<1x1x4x16x16xf32>
    %54 = vector.shape_cast %53 : vector<1x1x4x16x16xf32> to vector<1x4x16x16xf32>
    %55 = vector.extract_strided_slice %54 {offsets = [0, 0, 0, 0], sizes = [1, 1, 16, 16], strides = [1, 1, 1, 1]} : vector<1x4x16x16xf32> to vector<1x1x16x16xf32>
    %56 = vector.shape_cast %55 : vector<1x1x16x16xf32> to vector<1x16x16xf32>
    %c0_34 = arith.constant 0 : index
    %c2 = arith.constant 2 : index
    %c0_35 = arith.constant 0 : index
    %c0_36 = arith.constant 0 : index
    %57 = vector.load %arg5[%c0_34, %c2, %c0_35, %c0_36] : memref<1x34x16x16xf32, #tpu.memory_space<vmem>>, vector<1x1x16x16xf32>
    %58 = vector.shape_cast %57 : vector<1x1x16x16xf32> to vector<1x16x16xf32>
    %59 = vector.shape_cast %56 : vector<1x16x16xf32> to vector<1x1x16x16xf32>
    tpu.vector_store %arg5[%c0_34, %c2, %c0_35, %c0_36], %59 {strides = array<i32>} : memref<1x34x16x16xf32, #tpu.memory_space<vmem>>, vector<1x1x16x16xf32>,
    %60 = vector.extract_strided_slice %54 {offsets = [0, 1, 0, 0], sizes = [1, 1, 16, 16], strides = [1, 1, 1, 1]} : vector<1x4x16x16xf32> to vector<1x1x16x16xf32>
    %61 = vector.shape_cast %60 : vector<1x1x16x16xf32> to vector<1x16x16xf32>
    %c0_37 = arith.constant 0 : index
    %c6 = arith.constant 6 : index
    %c0_38 = arith.constant 0 : index
    %c0_39 = arith.constant 0 : index
    %62 = vector.load %arg5[%c0_37, %c6, %c0_38, %c0_39] : memref<1x34x16x16xf32, #tpu.memory_space<vmem>>, vector<1x1x16x16xf32>
    %63 = vector.shape_cast %62 : vector<1x1x16x16xf32> to vector<1x16x16xf32>
    %64 = vector.shape_cast %61 : vector<1x16x16xf32> to vector<1x1x16x16xf32>
    tpu.vector_store %arg5[%c0_37, %c6, %c0_38, %c0_39], %64 {strides = array<i32>} : memref<1x34x16x16xf32, #tpu.memory_space<vmem>>, vector<1x1x16x16xf32>,
    %65 = vector.extract_strided_slice %54 {offsets = [0, 2, 0, 0], sizes = [1, 1, 16, 16], strides = [1, 1, 1, 1]} : vector<1x4x16x16xf32> to vector<1x1x16x16xf32>
    %66 = vector.shape_cast %65 : vector<1x1x16x16xf32> to vector<1x16x16xf32>
    %c0_40 = arith.constant 0 : index
    %c10 = arith.constant 10 : index
    %c0_41 = arith.constant 0 : index
    %c0_42 = arith.constant 0 : index
    %67 = vector.load %arg5[%c0_40, %c10, %c0_41, %c0_42] : memref<1x34x16x16xf32, #tpu.memory_space<vmem>>, vector<1x1x16x16xf32>
    %68 = vector.shape_cast %67 : vector<1x1x16x16xf32> to vector<1x16x16xf32>
    %69 = vector.shape_cast %66 : vector<1x16x16xf32> to vector<1x1x16x16xf32>
    tpu.vector_store %arg5[%c0_40, %c10, %c0_41, %c0_42], %69 {strides = array<i32>} : memref<1x34x16x16xf32, #tpu.memory_space<vmem>>, vector<1x1x16x16xf32>,
    %70 = vector.extract_strided_slice %54 {offsets = [0, 3, 0, 0], sizes = [1, 1, 16, 16], strides = [1, 1, 1, 1]} : vector<1x4x16x16xf32> to vector<1x1x16x16xf32>
    %71 = vector.shape_cast %70 : vector<1x1x16x16xf32> to vector<1x16x16xf32>
    %c0_43 = arith.constant 0 : index
    %c14 = arith.constant 14 : index
    %c0_44 = arith.constant 0 : index
    %c0_45 = arith.constant 0 : index
    %72 = vector.load %arg5[%c0_43, %c14, %c0_44, %c0_45] : memref<1x34x16x16xf32, #tpu.memory_space<vmem>>, vector<1x1x16x16xf32>
    %73 = vector.shape_cast %72 : vector<1x1x16x16xf32> to vector<1x16x16xf32>
    %74 = vector.shape_cast %71 : vector<1x16x16xf32> to vector<1x1x16x16xf32>
    tpu.vector_store %arg5[%c0_43, %c14, %c0_44, %c0_45], %74 {strides = array<i32>} : memref<1x34x16x16xf32, #tpu.memory_space<vmem>>, vector<1x1x16x16xf32>,
    %75 = vector.extract_strided_slice %8 {offsets = [1, 0, 0, 0, 16], sizes = [1, 1, 4, 16, 16], strides = [1, 1, 1, 1, 1]} : vector<2x1x4x16x32xf32> to vector<1x1x4x16x16xf32>
    %76 = vector.shape_cast %75 : vector<1x1x4x16x16xf32> to vector<1x4x16x16xf32>
    %77 = vector.extract_strided_slice %76 {offsets = [0, 0, 0, 0], sizes = [1, 1, 16, 16], strides = [1, 1, 1, 1]} : vector<1x4x16x16xf32> to vector<1x1x16x16xf32>
    %78 = vector.shape_cast %77 : vector<1x1x16x16xf32> to vector<1x16x16xf32>
    %c0_46 = arith.constant 0 : index
    %c3 = arith.constant 3 : index
    %c0_47 = arith.constant 0 : index
    %c0_48 = arith.constant 0 : index
    %79 = vector.load %arg5[%c0_46, %c3, %c0_47, %c0_48] : memref<1x34x16x16xf32, #tpu.memory_space<vmem>>, vector<1x1x16x16xf32>
    %80 = vector.shape_cast %79 : vector<1x1x16x16xf32> to vector<1x16x16xf32>
    %81 = vector.shape_cast %78 : vector<1x16x16xf32> to vector<1x1x16x16xf32>
    tpu.vector_store %arg5[%c0_46, %c3, %c0_47, %c0_48], %81 {strides = array<i32>} : memref<1x34x16x16xf32, #tpu.memory_space<vmem>>, vector<1x1x16x16xf32>,
    %82 = vector.extract_strided_slice %76 {offsets = [0, 1, 0, 0], sizes = [1, 1, 16, 16], strides = [1, 1, 1, 1]} : vector<1x4x16x16xf32> to vector<1x1x16x16xf32>
    %83 = vector.shape_cast %82 : vector<1x1x16x16xf32> to vector<1x16x16xf32>
    %c0_49 = arith.constant 0 : index
    %c7 = arith.constant 7 : index
    %c0_50 = arith.constant 0 : index
    %c0_51 = arith.constant 0 : index
    %84 = vector.load %arg5[%c0_49, %c7, %c0_50, %c0_51] : memref<1x34x16x16xf32, #tpu.memory_space<vmem>>, vector<1x1x16x16xf32>
    %85 = vector.shape_cast %84 : vector<1x1x16x16xf32> to vector<1x16x16xf32>
    %86 = vector.shape_cast %83 : vector<1x16x16xf32> to vector<1x1x16x16xf32>
    tpu.vector_store %arg5[%c0_49, %c7, %c0_50, %c0_51], %86 {strides = array<i32>} : memref<1x34x16x16xf32, #tpu.memory_space<vmem>>, vector<1x1x16x16xf32>,
    %87 = vector.extract_strided_slice %76 {offsets = [0, 2, 0, 0], sizes = [1, 1, 16, 16], strides = [1, 1, 1, 1]} : vector<1x4x16x16xf32> to vector<1x1x16x16xf32>
    %88 = vector.shape_cast %87 : vector<1x1x16x16xf32> to vector<1x16x16xf32>
    %c0_52 = arith.constant 0 : index
    %c11 = arith.constant 11 : index
    %c0_53 = arith.constant 0 : index
    %c0_54 = arith.constant 0 : index
    %89 = vector.load %arg5[%c0_52, %c11, %c0_53, %c0_54] : memref<1x34x16x16xf32, #tpu.memory_space<vmem>>, vector<1x1x16x16xf32>
    %90 = vector.shape_cast %89 : vector<1x1x16x16xf32> to vector<1x16x16xf32>
    %91 = vector.shape_cast %88 : vector<1x16x16xf32> to vector<1x1x16x16xf32>
    tpu.vector_store %arg5[%c0_52, %c11, %c0_53, %c0_54], %91 {strides = array<i32>} : memref<1x34x16x16xf32, #tpu.memory_space<vmem>>, vector<1x1x16x16xf32>,
    %92 = vector.extract_strided_slice %76 {offsets = [0, 3, 0, 0], sizes = [1, 1, 16, 16], strides = [1, 1, 1, 1]} : vector<1x4x16x16xf32> to vector<1x1x16x16xf32>
    %93 = vector.shape_cast %92 : vector<1x1x16x16xf32> to vector<1x16x16xf32>
    %c0_55 = arith.constant 0 : index
    %c15 = arith.constant 15 : index
    %c0_56 = arith.constant 0 : index
    %c0_57 = arith.constant 0 : index
    %94 = vector.load %arg5[%c0_55, %c15, %c0_56, %c0_57] : memref<1x34x16x16xf32, #tpu.memory_space<vmem>>, vector<1x1x16x16xf32>
    %95 = vector.shape_cast %94 : vector<1x1x16x16xf32> to vector<1x16x16xf32>
    %96 = vector.shape_cast %93 : vector<1x16x16xf32> to vector<1x1x16x16xf32>
    tpu.vector_store %arg5[%c0_55, %c15, %c0_56, %c0_57], %96 {strides = array<i32>} : memref<1x34x16x16xf32, #tpu.memory_space<vmem>>, vector<1x1x16x16xf32>,
    %c0_58 = arith.constant 0 : index
    %c0_59 = arith.constant 0 : index
    %c0_60 = arith.constant 0 : index
    %c0_61 = arith.constant 0 : index
    %97 = tpu.strided_load %arg3[%c0_58, %c0_59, %c0_60, %c0_61] {strides = array<i32: 1, 1, 4, 1>} : memref<1x4x64x64xf32, #tpu.memory_space<vmem>>, vector<1x4x16x64xf32>
    %c0_62 = arith.constant 0 : index
    %c0_63 = arith.constant 0 : index
    %c2_64 = arith.constant 2 : index
    %c0_65 = arith.constant 0 : index
    %98 = tpu.strided_load %arg3[%c0_62, %c0_63, %c2_64, %c0_65] {strides = array<i32: 1, 1, 4, 1>} : memref<1x4x64x64xf32, #tpu.memory_space<vmem>>, vector<1x4x16x64xf32>
    %99 = arith.addf %97, %98 : vector<1x4x16x64xf32>
    %cst_66 = arith.constant 5.000000e-01 : f32
    %100 = vector.broadcast %cst_66 : f32 to vector<1x4x16x64xf32>
    %101 = arith.mulf %99, %100 : vector<1x4x16x64xf32>
    %102 = vector.shape_cast %101 : vector<1x4x16x64xf32> to vector<64x64xf32>
    %c0_67 = arith.constant 0 : index
    %c0_68 = arith.constant 0 : index
    %c1_69 = arith.constant 1 : index
    %c0_70 = arith.constant 0 : index
    %103 = tpu.strided_load %arg3[%c0_67, %c0_68, %c1_69, %c0_70] {strides = array<i32: 1, 1, 4, 1>} : memref<1x4x64x64xf32, #tpu.memory_space<vmem>>, vector<1x4x16x64xf32>
    %c0_71 = arith.constant 0 : index
    %c0_72 = arith.constant 0 : index
    %c3_73 = arith.constant 3 : index
    %c0_74 = arith.constant 0 : index
    %104 = tpu.strided_load %arg3[%c0_71, %c0_72, %c3_73, %c0_74] {strides = array<i32: 1, 1, 4, 1>} : memref<1x4x64x64xf32, #tpu.memory_space<vmem>>, vector<1x4x16x64xf32>
    %105 = arith.addf %103, %104 : vector<1x4x16x64xf32>
    %cst_75 = arith.constant 5.000000e-01 : f32
    %106 = vector.broadcast %cst_75 : f32 to vector<1x4x16x64xf32>
    %107 = arith.mulf %105, %106 : vector<1x4x16x64xf32>
    %108 = vector.shape_cast %107 : vector<1x4x16x64xf32> to vector<64x64xf32>
    %109 = tpu.concatenate %102, %108 in 0 : vector<64x64xf32>, vector<64x64xf32> -> vector<128x64xf32>
    %cst_76 = arith.constant dense<0.000000e+00> : vector<128x32xf32>
    %110 = tpu.matmul %109, %1, %cst_76 {dimension_numbers = #tpu.dot_dimension_numbers<[1], [0], [0], [1], [0, 0, 1, 1], [], []>, precision = #tpu.contract_precision<fp32>} : vector<128x64xf32>, vector<64x32xf32>, vector<128x32xf32> -> vector<128x32xf32>
    %111 = vector.shape_cast %110 : vector<128x32xf32> to vector<2x1x4x16x32xf32>
    %112 = vector.extract_strided_slice %111 {offsets = [0, 0, 0, 0, 0], sizes = [1, 1, 4, 16, 16], strides = [1, 1, 1, 1, 1]} : vector<2x1x4x16x32xf32> to vector<1x1x4x16x16xf32>
    %113 = vector.shape_cast %112 : vector<1x1x4x16x16xf32> to vector<1x4x16x16xf32>
    %114 = vector.extract_strided_slice %113 {offsets = [0, 0, 0, 0], sizes = [1, 1, 16, 16], strides = [1, 1, 1, 1]} : vector<1x4x16x16xf32> to vector<1x1x16x16xf32>
    %115 = vector.shape_cast %114 : vector<1x1x16x16xf32> to vector<1x16x16xf32>
    %c0_77 = arith.constant 0 : index
    %c16_78 = arith.constant 16 : index
    %c0_79 = arith.constant 0 : index
    %c0_80 = arith.constant 0 : index
    %116 = vector.load %arg5[%c0_77, %c16_78, %c0_79, %c0_80] : memref<1x34x16x16xf32, #tpu.memory_space<vmem>>, vector<1x1x16x16xf32>
    %117 = vector.shape_cast %116 : vector<1x1x16x16xf32> to vector<1x16x16xf32>
    %118 = vector.shape_cast %115 : vector<1x16x16xf32> to vector<1x1x16x16xf32>
    tpu.vector_store %arg5[%c0_77, %c16_78, %c0_79, %c0_80], %118 {strides = array<i32>} : memref<1x34x16x16xf32, #tpu.memory_space<vmem>>, vector<1x1x16x16xf32>,
    %119 = vector.extract_strided_slice %113 {offsets = [0, 1, 0, 0], sizes = [1, 1, 16, 16], strides = [1, 1, 1, 1]} : vector<1x4x16x16xf32> to vector<1x1x16x16xf32>
    %120 = vector.shape_cast %119 : vector<1x1x16x16xf32> to vector<1x16x16xf32>
    %c0_81 = arith.constant 0 : index
    %c20 = arith.constant 20 : index
    %c0_82 = arith.constant 0 : index
    %c0_83 = arith.constant 0 : index
    %121 = vector.load %arg5[%c0_81, %c20, %c0_82, %c0_83] : memref<1x34x16x16xf32, #tpu.memory_space<vmem>>, vector<1x1x16x16xf32>
    %122 = vector.shape_cast %121 : vector<1x1x16x16xf32> to vector<1x16x16xf32>
    %123 = vector.shape_cast %120 : vector<1x16x16xf32> to vector<1x1x16x16xf32>
    tpu.vector_store %arg5[%c0_81, %c20, %c0_82, %c0_83], %123 {strides = array<i32>} : memref<1x34x16x16xf32, #tpu.memory_space<vmem>>, vector<1x1x16x16xf32>,
    %124 = vector.extract_strided_slice %113 {offsets = [0, 2, 0, 0], sizes = [1, 1, 16, 16], strides = [1, 1, 1, 1]} : vector<1x4x16x16xf32> to vector<1x1x16x16xf32>
    %125 = vector.shape_cast %124 : vector<1x1x16x16xf32> to vector<1x16x16xf32>
    %c0_84 = arith.constant 0 : index
    %c24 = arith.constant 24 : index
    %c0_85 = arith.constant 0 : index
    %c0_86 = arith.constant 0 : index
    %126 = vector.load %arg5[%c0_84, %c24, %c0_85, %c0_86] : memref<1x34x16x16xf32, #tpu.memory_space<vmem>>, vector<1x1x16x16xf32>
    %127 = vector.shape_cast %126 : vector<1x1x16x16xf32> to vector<1x16x16xf32>
    %128 = vector.shape_cast %125 : vector<1x16x16xf32> to vector<1x1x16x16xf32>
    tpu.vector_store %arg5[%c0_84, %c24, %c0_85, %c0_86], %128 {strides = array<i32>} : memref<1x34x16x16xf32, #tpu.memory_space<vmem>>, vector<1x1x16x16xf32>,
    %129 = vector.extract_strided_slice %113 {offsets = [0, 3, 0, 0], sizes = [1, 1, 16, 16], strides = [1, 1, 1, 1]} : vector<1x4x16x16xf32> to vector<1x1x16x16xf32>
    %130 = vector.shape_cast %129 : vector<1x1x16x16xf32> to vector<1x16x16xf32>
    %c0_87 = arith.constant 0 : index
    %c28 = arith.constant 28 : index
    %c0_88 = arith.constant 0 : index
    %c0_89 = arith.constant 0 : index
    %131 = vector.load %arg5[%c0_87, %c28, %c0_88, %c0_89] : memref<1x34x16x16xf32, #tpu.memory_space<vmem>>, vector<1x1x16x16xf32>
    %132 = vector.shape_cast %131 : vector<1x1x16x16xf32> to vector<1x16x16xf32>
    %133 = vector.shape_cast %130 : vector<1x16x16xf32> to vector<1x1x16x16xf32>
    tpu.vector_store %arg5[%c0_87, %c28, %c0_88, %c0_89], %133 {strides = array<i32>} : memref<1x34x16x16xf32, #tpu.memory_space<vmem>>, vector<1x1x16x16xf32>,
    %134 = vector.extract_strided_slice %111 {offsets = [0, 0, 0, 0, 16], sizes = [1, 1, 4, 16, 16], strides = [1, 1, 1, 1, 1]} : vector<2x1x4x16x32xf32> to vector<1x1x4x16x16xf32>
    %135 = vector.shape_cast %134 : vector<1x1x4x16x16xf32> to vector<1x4x16x16xf32>
    %136 = vector.extract_strided_slice %135 {offsets = [0, 0, 0, 0], sizes = [1, 1, 16, 16], strides = [1, 1, 1, 1]} : vector<1x4x16x16xf32> to vector<1x1x16x16xf32>
    %137 = vector.shape_cast %136 : vector<1x1x16x16xf32> to vector<1x16x16xf32>
    %c0_90 = arith.constant 0 : index
    %c17_91 = arith.constant 17 : index
    %c0_92 = arith.constant 0 : index
    %c0_93 = arith.constant 0 : index
    %138 = vector.load %arg5[%c0_90, %c17_91, %c0_92, %c0_93] : memref<1x34x16x16xf32, #tpu.memory_space<vmem>>, vector<1x1x16x16xf32>
    %139 = vector.shape_cast %138 : vector<1x1x16x16xf32> to vector<1x16x16xf32>
    %140 = vector.shape_cast %137 : vector<1x16x16xf32> to vector<1x1x16x16xf32>
    tpu.vector_store %arg5[%c0_90, %c17_91, %c0_92, %c0_93], %140 {strides = array<i32>} : memref<1x34x16x16xf32, #tpu.memory_space<vmem>>, vector<1x1x16x16xf32>,
    %141 = vector.extract_strided_slice %135 {offsets = [0, 1, 0, 0], sizes = [1, 1, 16, 16], strides = [1, 1, 1, 1]} : vector<1x4x16x16xf32> to vector<1x1x16x16xf32>
    %142 = vector.shape_cast %141 : vector<1x1x16x16xf32> to vector<1x16x16xf32>
    %c0_94 = arith.constant 0 : index
    %c21 = arith.constant 21 : index
    %c0_95 = arith.constant 0 : index
    %c0_96 = arith.constant 0 : index
    %143 = vector.load %arg5[%c0_94, %c21, %c0_95, %c0_96] : memref<1x34x16x16xf32, #tpu.memory_space<vmem>>, vector<1x1x16x16xf32>
    %144 = vector.shape_cast %143 : vector<1x1x16x16xf32> to vector<1x16x16xf32>
    %145 = vector.shape_cast %142 : vector<1x16x16xf32> to vector<1x1x16x16xf32>
    tpu.vector_store %arg5[%c0_94, %c21, %c0_95, %c0_96], %145 {strides = array<i32>} : memref<1x34x16x16xf32, #tpu.memory_space<vmem>>, vector<1x1x16x16xf32>,
    %146 = vector.extract_strided_slice %135 {offsets = [0, 2, 0, 0], sizes = [1, 1, 16, 16], strides = [1, 1, 1, 1]} : vector<1x4x16x16xf32> to vector<1x1x16x16xf32>
    %147 = vector.shape_cast %146 : vector<1x1x16x16xf32> to vector<1x16x16xf32>
    %c0_97 = arith.constant 0 : index
    %c25 = arith.constant 25 : index
    %c0_98 = arith.constant 0 : index
    %c0_99 = arith.constant 0 : index
    %148 = vector.load %arg5[%c0_97, %c25, %c0_98, %c0_99] : memref<1x34x16x16xf32, #tpu.memory_space<vmem>>, vector<1x1x16x16xf32>
    %149 = vector.shape_cast %148 : vector<1x1x16x16xf32> to vector<1x16x16xf32>
    %150 = vector.shape_cast %147 : vector<1x16x16xf32> to vector<1x1x16x16xf32>
    tpu.vector_store %arg5[%c0_97, %c25, %c0_98, %c0_99], %150 {strides = array<i32>} : memref<1x34x16x16xf32, #tpu.memory_space<vmem>>, vector<1x1x16x16xf32>,
    %151 = vector.extract_strided_slice %135 {offsets = [0, 3, 0, 0], sizes = [1, 1, 16, 16], strides = [1, 1, 1, 1]} : vector<1x4x16x16xf32> to vector<1x1x16x16xf32>
    %152 = vector.shape_cast %151 : vector<1x1x16x16xf32> to vector<1x16x16xf32>
    %c0_100 = arith.constant 0 : index
    %c29 = arith.constant 29 : index
    %c0_101 = arith.constant 0 : index
    %c0_102 = arith.constant 0 : index
    %153 = vector.load %arg5[%c0_100, %c29, %c0_101, %c0_102] : memref<1x34x16x16xf32, #tpu.memory_space<vmem>>, vector<1x1x16x16xf32>
    %154 = vector.shape_cast %153 : vector<1x1x16x16xf32> to vector<1x16x16xf32>
    %155 = vector.shape_cast %152 : vector<1x16x16xf32> to vector<1x1x16x16xf32>
    tpu.vector_store %arg5[%c0_100, %c29, %c0_101, %c0_102], %155 {strides = array<i32>} : memref<1x34x16x16xf32, #tpu.memory_space<vmem>>, vector<1x1x16x16xf32>,
    %156 = vector.extract_strided_slice %111 {offsets = [1, 0, 0, 0, 0], sizes = [1, 1, 4, 16, 16], strides = [1, 1, 1, 1, 1]} : vector<2x1x4x16x32xf32> to vector<1x1x4x16x16xf32>
    %157 = vector.shape_cast %156 : vector<1x1x4x16x16xf32> to vector<1x4x16x16xf32>
    %158 = vector.extract_strided_slice %157 {offsets = [0, 0, 0, 0], sizes = [1, 1, 16, 16], strides = [1, 1, 1, 1]} : vector<1x4x16x16xf32> to vector<1x1x16x16xf32>
    %159 = vector.shape_cast %158 : vector<1x1x16x16xf32> to vector<1x16x16xf32>
    %c0_103 = arith.constant 0 : index
    %c18 = arith.constant 18 : index
    %c0_104 = arith.constant 0 : index
    %c0_105 = arith.constant 0 : index
    %160 = vector.load %arg5[%c0_103, %c18, %c0_104, %c0_105] : memref<1x34x16x16xf32, #tpu.memory_space<vmem>>, vector<1x1x16x16xf32>
    %161 = vector.shape_cast %160 : vector<1x1x16x16xf32> to vector<1x16x16xf32>
    %162 = vector.shape_cast %159 : vector<1x16x16xf32> to vector<1x1x16x16xf32>
    tpu.vector_store %arg5[%c0_103, %c18, %c0_104, %c0_105], %162 {strides = array<i32>} : memref<1x34x16x16xf32, #tpu.memory_space<vmem>>, vector<1x1x16x16xf32>,
    %163 = vector.extract_strided_slice %157 {offsets = [0, 1, 0, 0], sizes = [1, 1, 16, 16], strides = [1, 1, 1, 1]} : vector<1x4x16x16xf32> to vector<1x1x16x16xf32>
    %164 = vector.shape_cast %163 : vector<1x1x16x16xf32> to vector<1x16x16xf32>
    %c0_106 = arith.constant 0 : index
    %c22 = arith.constant 22 : index
    %c0_107 = arith.constant 0 : index
    %c0_108 = arith.constant 0 : index
    %165 = vector.load %arg5[%c0_106, %c22, %c0_107, %c0_108] : memref<1x34x16x16xf32, #tpu.memory_space<vmem>>, vector<1x1x16x16xf32>
    %166 = vector.shape_cast %165 : vector<1x1x16x16xf32> to vector<1x16x16xf32>
    %167 = vector.shape_cast %164 : vector<1x16x16xf32> to vector<1x1x16x16xf32>
    tpu.vector_store %arg5[%c0_106, %c22, %c0_107, %c0_108], %167 {strides = array<i32>} : memref<1x34x16x16xf32, #tpu.memory_space<vmem>>, vector<1x1x16x16xf32>,
    %168 = vector.extract_strided_slice %157 {offsets = [0, 2, 0, 0], sizes = [1, 1, 16, 16], strides = [1, 1, 1, 1]} : vector<1x4x16x16xf32> to vector<1x1x16x16xf32>
    %169 = vector.shape_cast %168 : vector<1x1x16x16xf32> to vector<1x16x16xf32>
    %c0_109 = arith.constant 0 : index
    %c26 = arith.constant 26 : index
    %c0_110 = arith.constant 0 : index
    %c0_111 = arith.constant 0 : index
    %170 = vector.load %arg5[%c0_109, %c26, %c0_110, %c0_111] : memref<1x34x16x16xf32, #tpu.memory_space<vmem>>, vector<1x1x16x16xf32>
    %171 = vector.shape_cast %170 : vector<1x1x16x16xf32> to vector<1x16x16xf32>
    %172 = vector.shape_cast %169 : vector<1x16x16xf32> to vector<1x1x16x16xf32>
    tpu.vector_store %arg5[%c0_109, %c26, %c0_110, %c0_111], %172 {strides = array<i32>} : memref<1x34x16x16xf32, #tpu.memory_space<vmem>>, vector<1x1x16x16xf32>,
    %173 = vector.extract_strided_slice %157 {offsets = [0, 3, 0, 0], sizes = [1, 1, 16, 16], strides = [1, 1, 1, 1]} : vector<1x4x16x16xf32> to vector<1x1x16x16xf32>
    %174 = vector.shape_cast %173 : vector<1x1x16x16xf32> to vector<1x16x16xf32>
    %c0_112 = arith.constant 0 : index
    %c30 = arith.constant 30 : index
    %c0_113 = arith.constant 0 : index
    %c0_114 = arith.constant 0 : index
    %175 = vector.load %arg5[%c0_112, %c30, %c0_113, %c0_114] : memref<1x34x16x16xf32, #tpu.memory_space<vmem>>, vector<1x1x16x16xf32>
    %176 = vector.shape_cast %175 : vector<1x1x16x16xf32> to vector<1x16x16xf32>
    %177 = vector.shape_cast %174 : vector<1x16x16xf32> to vector<1x1x16x16xf32>
    tpu.vector_store %arg5[%c0_112, %c30, %c0_113, %c0_114], %177 {strides = array<i32>} : memref<1x34x16x16xf32, #tpu.memory_space<vmem>>, vector<1x1x16x16xf32>,
    %178 = vector.extract_strided_slice %111 {offsets = [1, 0, 0, 0, 16], sizes = [1, 1, 4, 16, 16], strides = [1, 1, 1, 1, 1]} : vector<2x1x4x16x32xf32> to vector<1x1x4x16x16xf32>
    %179 = vector.shape_cast %178 : vector<1x1x4x16x16xf32> to vector<1x4x16x16xf32>
    %180 = vector.extract_strided_slice %179 {offsets = [0, 0, 0, 0], sizes = [1, 1, 16, 16], strides = [1, 1, 1, 1]} : vector<1x4x16x16xf32> to vector<1x1x16x16xf32>
    %181 = vector.shape_cast %180 : vector<1x1x16x16xf32> to vector<1x16x16xf32>
    %c0_115 = arith.constant 0 : index
    %c19 = arith.constant 19 : index
    %c0_116 = arith.constant 0 : index
    %c0_117 = arith.constant 0 : index
    %182 = vector.load %arg5[%c0_115, %c19, %c0_116, %c0_117] : memref<1x34x16x16xf32, #tpu.memory_space<vmem>>, vector<1x1x16x16xf32>
    %183 = vector.shape_cast %182 : vector<1x1x16x16xf32> to vector<1x16x16xf32>
    %184 = vector.shape_cast %181 : vector<1x16x16xf32> to vector<1x1x16x16xf32>
    tpu.vector_store %arg5[%c0_115, %c19, %c0_116, %c0_117], %184 {strides = array<i32>} : memref<1x34x16x16xf32, #tpu.memory_space<vmem>>, vector<1x1x16x16xf32>,
    %185 = vector.extract_strided_slice %179 {offsets = [0, 1, 0, 0], sizes = [1, 1, 16, 16], strides = [1, 1, 1, 1]} : vector<1x4x16x16xf32> to vector<1x1x16x16xf32>
    %186 = vector.shape_cast %185 : vector<1x1x16x16xf32> to vector<1x16x16xf32>
    %c0_118 = arith.constant 0 : index
    %c23 = arith.constant 23 : index
    %c0_119 = arith.constant 0 : index
    %c0_120 = arith.constant 0 : index
    %187 = vector.load %arg5[%c0_118, %c23, %c0_119, %c0_120] : memref<1x34x16x16xf32, #tpu.memory_space<vmem>>, vector<1x1x16x16xf32>
    %188 = vector.shape_cast %187 : vector<1x1x16x16xf32> to vector<1x16x16xf32>
    %189 = vector.shape_cast %186 : vector<1x16x16xf32> to vector<1x1x16x16xf32>
    tpu.vector_store %arg5[%c0_118, %c23, %c0_119, %c0_120], %189 {strides = array<i32>} : memref<1x34x16x16xf32, #tpu.memory_space<vmem>>, vector<1x1x16x16xf32>,
    %190 = vector.extract_strided_slice %179 {offsets = [0, 2, 0, 0], sizes = [1, 1, 16, 16], strides = [1, 1, 1, 1]} : vector<1x4x16x16xf32> to vector<1x1x16x16xf32>
    %191 = vector.shape_cast %190 : vector<1x1x16x16xf32> to vector<1x16x16xf32>
    %c0_121 = arith.constant 0 : index
    %c27 = arith.constant 27 : index
    %c0_122 = arith.constant 0 : index
    %c0_123 = arith.constant 0 : index
    %192 = vector.load %arg5[%c0_121, %c27, %c0_122, %c0_123] : memref<1x34x16x16xf32, #tpu.memory_space<vmem>>, vector<1x1x16x16xf32>
    %193 = vector.shape_cast %192 : vector<1x1x16x16xf32> to vector<1x16x16xf32>
    %194 = vector.shape_cast %191 : vector<1x16x16xf32> to vector<1x1x16x16xf32>
    tpu.vector_store %arg5[%c0_121, %c27, %c0_122, %c0_123], %194 {strides = array<i32>} : memref<1x34x16x16xf32, #tpu.memory_space<vmem>>, vector<1x1x16x16xf32>,
    %195 = vector.extract_strided_slice %179 {offsets = [0, 3, 0, 0], sizes = [1, 1, 16, 16], strides = [1, 1, 1, 1]} : vector<1x4x16x16xf32> to vector<1x1x16x16xf32>
    %196 = vector.shape_cast %195 : vector<1x1x16x16xf32> to vector<1x16x16xf32>
    %c0_124 = arith.constant 0 : index
    %c31 = arith.constant 31 : index
    %c0_125 = arith.constant 0 : index
    %c0_126 = arith.constant 0 : index
    %197 = vector.load %arg5[%c0_124, %c31, %c0_125, %c0_126] : memref<1x34x16x16xf32, #tpu.memory_space<vmem>>, vector<1x1x16x16xf32>
    %198 = vector.shape_cast %197 : vector<1x1x16x16xf32> to vector<1x16x16xf32>
    %199 = vector.shape_cast %196 : vector<1x16x16xf32> to vector<1x1x16x16xf32>
    tpu.vector_store %arg5[%c0_124, %c31, %c0_125, %c0_126], %199 {strides = array<i32>} : memref<1x34x16x16xf32, #tpu.memory_space<vmem>>, vector<1x1x16x16xf32>,
    %c0_127 = arith.constant 0 : index
    %c0_128 = arith.constant 0 : index
    %c0_129 = arith.constant 0 : index
    %c0_130 = arith.constant 0 : index
    %200 = vector.load %arg4[%c0_127, %c0_128, %c0_129, %c0_130] : memref<1x2x16x16xf32, #tpu.memory_space<vmem>>, vector<1x2x16x16xf32>
    %c0_131 = arith.constant 0 : index
    %c32 = arith.constant 32 : index
    %c0_132 = arith.constant 0 : index
    %c0_133 = arith.constant 0 : index
    %201 = vector.load %arg5[%c0_131, %c32, %c0_132, %c0_133] : memref<1x34x16x16xf32, #tpu.memory_space<vmem>>, vector<1x2x16x16xf32>
    tpu.vector_store %arg5[%c0_131, %c32, %c0_132, %c0_133], %200 {strides = array<i32>} : memref<1x34x16x16xf32, #tpu.memory_space<vmem>>, vector<1x2x16x16xf32>,
    return
  }
  func.func @transform_0(%arg0: i32) -> (i32, i32) {
    %c0_i32 = arith.constant 0 : i32
    %c0_i32_0 = arith.constant 0 : i32
    %c0_i32_1 = arith.constant 0 : i32
    return %c0_i32, %c0_i32_0 : i32, i32
  }
  func.func @transform_1(%arg0: i32) -> (i32, i32) {
    %c0_i32 = arith.constant 0 : i32
    %c0_i32_0 = arith.constant 0 : i32
    %c0_i32_1 = arith.constant 0 : i32
    return %c0_i32, %c0_i32_0 : i32, i32
  }
  func.func @transform_2(%arg0: i32) -> (i32, i32, i32, i32) {
    %c0_i32 = arith.constant 0 : i32
    %c0_i32_0 = arith.constant 0 : i32
    %c0_i32_1 = arith.constant 0 : i32
    %c0_i32_2 = arith.constant 0 : i32
    return %arg0, %c0_i32, %c0_i32_0, %c0_i32_1 : i32, i32, i32, i32
  }
  func.func @transform_3(%arg0: i32) -> (i32, i32, i32, i32) {
    %c0_i32 = arith.constant 0 : i32
    %c0_i32_0 = arith.constant 0 : i32
    %c0_i32_1 = arith.constant 0 : i32
    %c0_i32_2 = arith.constant 0 : i32
    return %arg0, %c0_i32, %c0_i32_0, %c0_i32_1 : i32, i32, i32, i32
  }
  func.func @transform_4(%arg0: i32) -> (i32, i32, i32, i32) {
    %c0_i32 = arith.constant 0 : i32
    %c0_i32_0 = arith.constant 0 : i32
    %c0_i32_1 = arith.constant 0 : i32
    %c0_i32_2 = arith.constant 0 : i32
    return %arg0, %c0_i32, %c0_i32_0, %c0_i32_1 : i32, i32, i32, i32
  }
}

</mosaic_0001>

<bundles_post_ra>
// kernel: _metnet_preprocessor.1
= control target key start
LH: loop header
LB: loop body
LE: loop exit
PB: predicated region body
PF: predicated region fallthrough
CT: control target
= control target key end

     0   :  { %9 = vsyncpa [#allocation3], 0  ;;  %s3639_s0 = inlined_call_operand.hbm [shape: f32[64,32], index: 0, kind: input, shape index: {}]   ;;  %s3640_s1 = inlined_call_operand.hbm [shape: f32[64,32], index: 1, kind: input, shape index: {}]   ;;  %s3641_s2 = inlined_call_operand.hbm [shape: f32[6,6,64,64], index: 2, kind: input, shape index: {}]   ;;  %s3642_s3 = inlined_call_operand.vmem [shape: f32[6,2,16,16], index: 3, kind: input, shape index: {}]   ;;  %s3643_s4 = inlined_call_operand.vmem [shape: f32[6,34,16,16], index: 4, kind: output, shape index: {}]  }
   0x1   :  { %10 = vsyncpa [#allocation5], 0  ;;  %s2597_s15 = smov 0   ;;  %s2599_s16 = smov 0  }
   0x2   :  { %s2601_s17 = smov 0   ;;  %s2603_s18 = smov 0  }
   0x3 LB: > { %s2616_s19 = sadd.s32 4294967295, %s2565_s18   ;;  %p78_p0 = scmp.ne.s32.totalorder %s2557_s16, %s2553_s15  ;;  %s2565_s18 = sphi %s2603_s18, %s3676_s18   ;;  %s2561_s17 = sphi %s2601_s17, %s3675_s17   ;;  %s2557_s16 = sphi %s2599_s16, %s3674_s16   ;;  %s2553_s15 = sphi %s2597_s15, %s3673_s15  }
   0x4   : > { %p79_p1 = scmp.eq.s32.totalorder %s2616_s19, 0  ;;  %p2239_p2 = scmp.ge.s32.totalorder %s2565_s18, 1 }
   0x5   : > { %p141_p3 = scmp.lt.s32.totalorder %s2565_s18, 7  ;;  %s152_s23 = sshll.u32 %s3639_s0, 4  ;;  %s153_s23 = int_to_ptr.hbm [resolvable:$true] %s152_s23 }
   0x6   : > { %p2624_p4 = por %p79_p1, %p78_p0  ;;  %s2567_s25 = smov [#allocation2]  }
   0x7   : > { %p2631_p5 = pnand %p2239_p2, %p141_p3  ;;  %s154_s26 = sshll.u32 %s2567_s25, 4  ;;  %s155_s26 = int_to_ptr.vmem [resolvable:$true] %s154_s26 }
   0x8   : > { %s166_s29 = sshll.u32 %s3640_s1, 4  ;;  %s2568_s30 = smov 128   ;;  %s167_s29 = int_to_ptr.hbm [resolvable:$true] %s166_s29 }
   0x9   : > { %p2380_p6 = pneg %p2631_p5  ;;  %s2569_s5 = smov 8  }
   0xa   : > { %s2570_s6 = smov [#allocation4]   ;;  %s2649_s8 = sadd.s32 1, %s2565_s18  }
   0xb   : > { %p2381_p7 = pnand %p2380_p6, %p79_p1  ;;  %s168_s7 = sshll.u32 %s2570_s6, 4  ;;  %s169_s7 = int_to_ptr.vmem [resolvable:$true] %s168_s7 }
   0xc   : > { %s65_s9 = sadd.s32 1, %s2561_s17  ;;  %s62_s10 = ssub.s32 %s2565_s18, %s2649_s8 }
   0xd   : > { %2383 = dma.hbm_to_vmem [thread:$0]  (!%p2381_p7), %s153_s23, 1024, %s155_s26, [#allocation3], %s2568_s30, %s2568_s30, %s2569_s5  }
   0xe   : > { %2386 = dma.hbm_to_vmem [thread:$0]  (!%p2381_p7), %s167_s29, 1024, %s169_s7, [#allocation5], %s2568_s30, %s2568_s30, %s2569_s5  }
   0xf   : > { %p72_p8 = scmp.ne.s32.totalorder %s2561_s17, %s2557_s16  ;;  %p63_p9 = scmp.eq.s32.totalorder %s62_s10, 0 }
  0x10   : > { %p73_p10 = scmp.eq.s32.totalorder %s2565_s18, 0  ;;  %p2393_p11 = scmp.lt.s32.totalorder %s2565_s18, 6 }
  0x11   : > { %s182_s11 = sand.u32 1, %s2565_s18   ;;  %s184_s13 = sand.u32 1, %s2561_s17  }
  0x12   : > { %s2660_s12 = scalar_select %p63_p9, %s2561_s17, %s65_s9  }
  0x13   : > { %p74_p12 = por %p73_p10, %p72_p8  ;;  %s2368_s14 = smul.u32 384, %s2565_s18 }
  0x14   : > { %s2243_s15 = sshll.u32 %s184_s13, 8  ;;  %s183_s29 = scalar_lea.sflag [#allocation3], %s182_s11 }
  0x15   : > { %p2664_p13 = pnand %p2393_p11, %p74_p12  ;;  %s191_s25 = scalar_lea.hbm %s3641_s2, %s2368_s14 }
  0x16   : > { %s192_s26 = sshll.u32 %s191_s25, 4  ;;  %s186_s27 = scalar_lea.vmem [#allocation6], %s2243_s15  ;;  %s193_s26 = int_to_ptr.hbm [resolvable:$true] %s192_s26 }
  0x17   : > { %s194_s28 = sshll.u32 %s186_s27, 4  ;;  %s2493_s6 = sshra.s32 %s193_s26, 4  ;;  %s195_s28 = int_to_ptr.vmem [resolvable:$true] %s194_s28  ;;  %s2494_s6 = int_to_ptr.hbm [resolvable:$true] %s2493_s6 }
  0x18   : > { %s2495_s7 = scalar_lea.hbm %s2494_s6, 256  ;;  %p2497_p2 = pneg %p2664_p13 }
  0x19   : > { %p2496_p0 = scmp.ne.s32.totalorder %s2494_s6, %s2495_s7  ;;  %s2500_s10 = scalar_lea.hbm %s3641_s2, 2304 }
  0x1a   : > { %p2501_p7 = scmp.lt.s32.totalorder %s2494_s6, %s3641_s2  ;;  %p2502_p8 = scmp.lt.s32.totalorder %s2500_s10, %s2495_s7 }
  0x1b   : > { %p2498_p3 = pnand %p2497_p2, %p2496_p0 }
  0x1c   : > { %p2503_p9 = por %p2502_p8, %p2501_p7 }
  0x1d   : > { %p2499_p6 = pneg %p2498_p3 }
  0x1f   : > { %p2504_p10 = pnand %p2503_p9, %p2499_p6 }
  0x21   : > { %2507 = shalt.err (!%p2504_p10)
}
  0x22   : > { %2390 = dma.hbm_to_vmem [thread:$0]  (!%p2664_p13), %s193_s26, 4096, %s195_s28, %s183_s29, %s2568_s30, %s2568_s30, %s2569_s5  }
  0x23   : > { %214 = sbr.rel (%p2631_p5) target bundleno = 697 (0x2b9), region = 36 }
  0x28   : > { %2540 = dma.done.wait (%p79_p1), [#allocation3], 1024  }
  0x29   : > { %2542 = vsyncadd (%p79_p1), [#allocation3], 4294966272 }
  0x2a   : > { %2544 = dma.done.wait (%p79_p1), [#allocation5], 1024  }
  0x2b   : > { %2546 = vsyncadd (%p79_p1), [#allocation5], 4294966272  ;;  %s226_s11 = sand.u32 1, %s2616_s19   ;;  %s228_s30 = sand.u32 1, %s2557_s16  }
  0x2c   : > { %s2248_s5 = sshll.u32 %s228_s30, 8  ;;  %s227_s24 = scalar_lea.sflag [#allocation3], %s226_s11 }
  0x2d   : > { %s2696_s15 = scalar_lea.vmem [#allocation6], %s2248_s5 }
  0x2e   : > { %2548 = dma.done.wait (%p2624_p4), %s227_s24, 4096  }
  0x2f   : > { %2550 = vsyncadd (%p2624_p4), %s227_s24, 4294963200  ;;  %v278_v0 = vld [vmem:[#allocation2 + $0x38] sm:$0xff]  ;;  %v277_v1 = vld [vmem:[#allocation2 + $0x30] sm:$0xff]  ;;  %vm319_vm0 = vcmask 523264   ;;  %p261_p1 = scmp.lt.s32.totalorder %s2616_s19, 5  ;;  %vm1070_vm1 = vcmask 130048  }
  0x30   : > { %v276_v2 = vld [vmem:[#allocation2 + $0x28] sm:$0xff]  ;;  %v2702_v3 = vand.u32 4294901760, %v278_v0  ;;  %v2704_v4 = vand.u32 4294901760, %v277_v1  ;;  %v275_v6 = vld [vmem:[#allocation2 + $0x20] sm:$0xff]  ;;  %v274_v7 = vld [vmem:[#allocation2 + $0x18] sm:$0xff]  ;;  %s2571_s25 = smov 112  }
  0x31   : > { %v2706_v5 = vand.u32 4294901760, %v276_v2  ;;  %v273_v8 = vld [vmem:[#allocation2 + $0x10] sm:$0xff]  ;;  %v2708_v9 = vand.u32 4294901760, %v275_v6  ;;  %v2710_v10 = vand.u32 4294901760, %v274_v7  ;;  %v272_v12 = vld [vmem:[#allocation2 + $0x8] sm:$0xff]  ;;  %v271_v13 = vld [vmem:[#allocation2] sm:$0xff] }
  0x32   : > { %v2712_v11 = vand.u32 4294901760, %v273_v8  ;;  %377 = vmatpush.msra.mxu0 %v2702_v3  ;;  %v2716_v14 = vsub.f32 %v278_v0, %v2702_v3  ;;  %764 = vmatpush.msra.mxu3 %v2702_v3  ;;  %v2720_v15 = vsub.f32 %v277_v1, %v2704_v4  ;;  %v2725_v17 = vand.u32 4294901760, %v272_v12  ;;  %v2252_v18 = vld [vmem:[%s2696_s15 + $0x10] ss:$2 sm:$0xff]  ;;  %v2253_v37 = vld [vmem:[%s2696_s15 + $0x20] ss:$2 sm:$0xff] }
  0x33   : > { %v2723_v16 = vsub.f32 %v276_v2, %v2706_v5  ;;  %v2729_v19 = vsub.f32 %v275_v6, %v2708_v9  ;;  %v2732_v20 = vsub.f32 %v274_v7, %v2710_v10  ;;  %v2734_v21 = vand.u32 4294901760, %v271_v13  ;;  %v286_v34 = vld [vmem:[#allocation4 + $0x38] sm:$0xff]  ;;  %v285_v45 = vld [vmem:[#allocation4 + $0x30] sm:$0xff]  ;;  %v2255_v6 = vld [vmem:[%s2696_s15 + $0x60] ss:$2 sm:$0xff]  ;;  %s3678_s19 = smov (!%p261_p1, %s2616_s19), 5 }
  0x34   : > { %v2737_v22 = vsub.f32 %v273_v8, %v2712_v11  ;;  %379 = vmatpush.msra.mxu0 %v2704_v4  ;;  %652 = vmatpush.msra.mxu2 %v2716_v14  ;;  %v531_v23 = vand.u32 4294901760, %v2716_v14  ;;  %v537_v24 = vand.u32 4294901760, %v2720_v15  ;;  %v321_v26 = vsel %vm319_vm0, %v2252_v18, 0  ;;  %v2254_v42 = vld [vmem:[%s2696_s15 + $0x50] ss:$2 sm:$0xff]  ;;  %s2369_s20 = smul.u32 544, %s3678_s19 }
  0x35   : > { %v543_v25 = vand.u32 4294901760, %v2723_v16  ;;  %766 = vmatpush.msra.mxu3 %v2704_v4  ;;  %v549_v27 = vand.u32 4294901760, %v2729_v19  ;;  %v2747_v28 = vand.u32 4294901760, %v321_v26  ;;  %v2750_v29 = vsub.f32 %v272_v12, %v2725_v17  ;;  %s2367_s26 = sshll.u32 %s3678_s19, 5 }
  0x36   : > { %381 = vmatpush.msra.mxu0 %v2706_v5  ;;  %655 = vmatpush.msra.mxu2 %v2720_v15  ;;  %v532_v30 = vsub.f32 %v2716_v14, %v531_v23  ;;  %v538_v31 = vsub.f32 %v2720_v15, %v537_v24  ;;  %v555_v33 = vand.u32 4294901760, %v2732_v20  ;;  %v561_v36 = vand.u32 4294901760, %v2737_v22  ;;  %s3312_s23 = scalar_lea.vmem %s3643_s4, %s2369_s20  ;;  %s265_s29 = scalar_lea.vmem %s3642_s3, %s2367_s26 }
  0x37   : > { %v544_v32 = vsub.f32 %v2723_v16, %v543_v25  ;;  %768 = vmatpush.msra.mxu3 %v2706_v5  ;;  %v2766_v35 = vsub.f32 %v321_v26, %v2747_v28  ;;  %v550_v40 = vsub.f32 %v2729_v19, %v549_v27  ;;  %v2776_v41 = vsub.f32 %v271_v13, %v2734_v21 }
  0x38   : > { %383 = vmatpush.msra.mxu0 %v2708_v9  ;;  %v533_v38 = vand.u32 4294901760, %v532_v30  ;;  %658 = vmatpush.msra.mxu2 %v2723_v16  ;;  %v539_v39 = vand.u32 4294901760, %v538_v31  ;;  %v2781_v44 = vand.u32 4294901760, %v286_v34  ;;  %v556_v47 = vsub.f32 %v2732_v20, %v555_v33  ;;  %v2257_v16 = vld [vmem:[%s2696_s15 + $0xa0] ss:$2 sm:$0xff] }
  0x39   : > { %770 = vmatpush.msra.mxu3 %v2708_v9  ;;  %v394_v43 = vand.u32 4294901760, %v2766_v35  ;;  %v545_v46 = vand.u32 4294901760, %v544_v32  ;;  %v567_v48 = vand.u32 4294901760, %v2750_v29  ;;  %v324_v49 = vsel %vm319_vm0, %v2253_v37, 0 }
  0x3a   : > { %385 = vmatpush.msra.mxu0 %v2710_v10  ;;  %534 = vmatpush.msra.mxu1 %v533_v38  ;;  %v2793_v51 = vsub.f32 %v286_v34, %v2781_v44  ;;  %v2795_v52 = vand.u32 4294901760, %v324_v49  ;;  %v327_v53 = vsel %vm319_vm0, %v2254_v42, 0  ;;  %v551_v54 = vand.u32 4294901760, %v550_v40  ;;  %v284_v38 = vld [vmem:[#allocation4 + $0x28] sm:$0xff] }
  0x3b   : > { %661 = vmatpush.msra.mxu2 %v2729_v19  ;;  %772 = vmatpush.msra.mxu3 %v2710_v10  ;;  %v395_v50 = vsub.f32 %v2766_v35, %v394_v43  ;;  %v562_v55 = vsub.f32 %v2737_v22, %v561_v36  ;;  %v573_v56 = vand.u32 4294901760, %v2776_v41  ;;  %v2803_v57 = vand.u32 4294901760, %v285_v45 }
  0x3c   : > { %387 = vmatpush.msra.mxu0 %v2712_v11  ;;  %540 = vmatpush.msra.mxu1 %v539_v39  ;;  %v1480_v59 = vand.u32 4294901760, %v2793_v51  ;;  %v401_v60 = vsub.f32 %v324_v49, %v2795_v52  ;;  %v2809_v61 = vand.u32 4294901760, %v327_v53  ;;  %v557_v62 = vand.u32 4294901760, %v556_v47 }
  0x3d   : > { %664 = vmatpush.msra.mxu2 %v2732_v20  ;;  %774 = vmatpush.msra.mxu3 %v2712_v11  ;;  %v396_v58 = vand.u32 4294901760, %v395_v50  ;;  %v568_v63 = vsub.f32 %v2750_v29, %v567_v48  ;;  %v2816_v0 = vsub.f32 %v285_v45, %v2803_v57  ;;  %v563_v7 = vand.u32 4294901760, %v562_v55  ;;  %v2259_v55 = vld [vmem:[%s2696_s15 + $0xe0] ss:$2 sm:$0xff] }
  0x3e   : > { %389 = vmatpush.msra.mxu0 %v2725_v17  ;;  %546 = vmatpush.msra.mxu1 %v545_v46  ;;  %v1481_v1 = vsub.f32 %v2793_v51, %v1480_v59  ;;  %v402_v2 = vand.u32 4294901760, %v401_v60  ;;  %v574_v8 = vsub.f32 %v2776_v41, %v573_v56  ;;  %v409_v18 = vsub.f32 %v327_v53, %v2809_v61 }
  0x3f   : > { %667 = vmatpush.msra.mxu2 %v2737_v22  ;;  %776 = vmatpush.msra.mxu3 %v2725_v17  ;;  %v1486_v12 = vand.u32 4294901760, %v2816_v0  ;;  %v569_v26 = vand.u32 4294901760, %v568_v63  ;;  %v330_v32 = vsel %vm319_vm0, %v2255_v6, 0  ;;  %v2843_v45 = vand.u32 4294901760, %v284_v38 }
  0x40   : > { %391 = vmatpush.msra.mxu0 %v2734_v21  ;;  %552 = vmatpush.msra.mxu1 %v551_v54  ;;  %v403_v13 = vsub.f32 %v401_v60, %v402_v2  ;;  %v1482_v30 = vand.u32 4294901760, %v1481_v1  ;;  %v575_v34 = vand.u32 4294901760, %v574_v8  ;;  %v410_v40 = vand.u32 4294901760, %v409_v18 }
  0x41   : > { %397 = vmatmul.f32.vlgmr.msra.gmra.mxu0 %v396_v58  ;;  %670 = vmatpush.msra.mxu2 %v2750_v29  ;;  %v1487_v31 = vsub.f32 %v2816_v0, %v1486_v12  ;;  %v2841_v42 = vand.u32 4294901760, %v330_v32  ;;  %v336_v53 = vsel %vm319_vm0, %v2257_v16, 0 }
  0x42   : > { %558 = vmatpush.msra.mxu1 %v557_v62  ;;  %778 = vmatpush.msra.mxu3 %v2734_v21  ;;  %v404_v39 = vand.u32 4294901760, %v403_v13  ;;  %v411_v14 = vsub.f32 %v409_v18, %v410_v40  ;;  %v2880_v20 = vand.u32 4294901760, %v336_v53  ;;  %v282_v62 = vld [vmem:[#allocation4 + $0x18] sm:$0xff] }
  0x43   : > { %673 = vmatpush.msra.mxu2 %v2776_v41  ;;  %782 = vmatmul.f32.vlgmr.msra.gmra.mxu3 %v394_v43  ;;  %v1488_v37 = vand.u32 4294901760, %v1487_v31  ;;  %v2850_v43 = vsub.f32 %v284_v38, %v2843_v45  ;;  %v2918_v6 = vand.u32 4294901760, %v282_v62 }
  0x44   : > { %564 = vmatpush.msra.mxu1 %v563_v7  ;;  %676 = vmatmul.f32.vlgmr.msra.gmra.mxu2 %v2766_v35  ;;  %v2256_v35 = vld [vmem:[%s2696_s15 + $0x90] ss:$2 sm:$0xff]  ;;  %v412_v47 = vand.u32 4294901760, %v411_v14  ;;  %v433_v29 = vsub.f32 %v336_v53, %v2880_v20  ;;  %v2260_v7 = vld [vmem:[%s2696_s15 + $0x11] ss:$2 sm:$0xff] }
  0x45   : > { %1326 = vmatpush.msrb.mxu2 %v2781_v44  ;;  %887 = vmatpush.msrb.mxu0 %v531_v23  ;;  %v417_v23 = vsub.f32 %v330_v32, %v2841_v42  ;;  %v1492_v46 = vand.u32 4294901760, %v2850_v43  ;;  %v333_v15 = vsel %vm319_vm0, %v2256_v35, 0  ;;  %v2923_v8 = vsub.f32 %v282_v62, %v2918_v6  ;;  %v2264_v62 = vld [vmem:[%s2696_s15 + $0x91] ss:$2 sm:$0xff] }
  0x46   : > { %570 = vmatpush.msra.mxu1 %v569_v26  ;;  %1483 = vmatpush.msrb.mxu3 %v1482_v30  ;;  %v2864_v50 = vand.u32 4294901760, %v333_v15  ;;  %v434_v41 = vand.u32 4294901760, %v433_v29  ;;  %v345_v30 = vsel %vm319_vm0, %v2260_v7, 0 }
  0x47   : > { %1328 = vmatpush.msrb.mxu2 %v2803_v57  ;;  %891 = vmatpush.msrb.mxu0 %v537_v24  ;;  %v1493_v24 = vsub.f32 %v2850_v43, %v1492_v46  ;;  %v418_v49 = vand.u32 4294901760, %v417_v23  ;;  %v1504_v26 = vand.u32 4294901760, %v2923_v8 }
  0x48   : > { %576 = vmatpush.msra.mxu1 %v575_v34  ;;  %1489 = vmatpush.msrb.mxu3 %v1488_v37  ;;  %v2934_v37 = vand.u32 4294901760, %v345_v30 }
  0x49   : > { %405 = vmatmul.f32.gmra.mxu0 %v404_v39  ;;  %578 = vmatmul.f32.vlgmr.msra.gmra.mxu1 %v2747_v28  ;;  %v1505_v31 = vsub.f32 %v2923_v8, %v1504_v26  ;;  %v2261_v39 = vld [vmem:[%s2696_s15 + $0x21] ss:$2 sm:$0xff] }
  0x4a   : > { %990 = vmatpush.msrb.mxu1 %v2702_v3  ;;  %1330 = vmatpush.msrb.mxu2 %v2843_v45  ;;  %v1494_v3 = vand.u32 4294901760, %v1493_v24  ;;  %v457_v35 = vsub.f32 %v345_v30, %v2934_v37  ;;  %v348_v14 = vsel %vm319_vm0, %v2261_v39, 0  ;;  %v2265_v39 = vld [vmem:[%s2696_s15 + $0xa1] ss:$2 sm:$0xff] }
  0x4b   : > { %788 = vmatmul.f32.gmra.mxu3 %v402_v2  ;;  %895 = vmatpush.msrb.mxu0 %v543_v25  ;;  %v425_v25 = vsub.f32 %v333_v15, %v2864_v50  ;;  %v1506_v38 = vand.u32 4294901760, %v1505_v31 }
  0x4c   : > { %681 = vmatmul.f32.gmra.mxu2 %v401_v60  ;;  %992 = vmatpush.msrb.mxu1 %v2704_v4  ;;  %v419_v4 = vsub.f32 %v417_v23, %v418_v49  ;;  %v342_v60 = vsel %vm319_vm0, %v2259_v55, 0  ;;  %v458_v24 = vand.u32 4294901760, %v457_v35 }
  0x4d   : > { %899 = vmatpush.msrb.mxu0 %v549_v27  ;;  %1495 = vmatpush.msrb.mxu3 %v1494_v3  ;;  %v426_v19 = vand.u32 4294901760, %v425_v25  ;;  %v2916_v2 = vand.u32 4294901760, %v342_v60  ;;  %v2262_v3 = vld [vmem:[%s2696_s15 + $0x51] ss:$2 sm:$0xff] }
  0x4e   : > { %994 = vmatpush.msrb.mxu1 %v2706_v5  ;;  %v283_v5 = vld [vmem:[#allocation4 + $0x20] sm:$0xff] }
  0x4f   : > { %903 = vmatpush.msrb.mxu0 %v555_v33  ;;  %v2882_v27 = vand.u32 4294901760, %v283_v5 }
  0x50   : > { %996 = vmatpush.msrb.mxu1 %v2708_v9  ;;  %v420_v9 = vand.u32 4294901760, %v419_v4  ;;  %v459_v4 = vsub.f32 %v457_v35, %v458_v24 }
  0x51   : > { %413 = vmatmul.f32.gmra.mxu0 %v412_v47  ;;  %582 = vmatmul.f32.gmra.mxu1 %v2795_v52  ;;  %v2890_v22 = vsub.f32 %v283_v5, %v2882_v27  ;;  %v2940_v47 = vand.u32 4294901760, %v348_v14  ;;  %v351_v5 = vsel %vm319_vm0, %v2262_v3, 0 }
  0x52   : > { %998 = vmatpush.msrb.mxu1 %v2710_v10  ;;  %907 = vmatpush.msrb.mxu0 %v561_v36  ;;  %v2258_v10 = vld [vmem:[%s2696_s15 + $0xd0] ss:$2 sm:$0xff] }
  0x53   : > { %794 = vmatmul.f32.gmra.mxu3 %v410_v40  ;;  %1332 = vmatpush.msrb.mxu2 %v2882_v27  ;;  %v339_v33 = vsel %vm319_vm0, %v2258_v10, 0 }
  0x54   : > { %686 = vmatmul.f32.gmra.mxu2 %v409_v18  ;;  %1000 = vmatpush.msrb.mxu1 %v2712_v11  ;;  %v427_v11 = vsub.f32 %v425_v25, %v426_v19  ;;  %v449_v18 = vsub.f32 %v342_v60, %v2916_v2 }
  0x55   : > { %911 = vmatpush.msrb.mxu0 %v567_v48  ;;  %v2906_v48 = vand.u32 4294901760, %v339_v33  ;;  %1334 = vmatpush.msrb.mxu2 %v2918_v6 }
  0x56   : > { %1002 = vmatpush.msrb.mxu1 %v2725_v17  ;;  %v1498_v17 = vand.u32 4294901760, %v2890_v22  ;;  %v428_v36 = vand.u32 4294901760, %v427_v11  ;;  %v450_v34 = vand.u32 4294901760, %v449_v18  ;;  %v2958_v11 = vand.u32 4294901760, %v351_v5 }
  0x57   : > { %915 = vmatpush.msrb.mxu0 %v573_v56  ;;  %v435_v56 = vsub.f32 %v433_v29, %v434_v41  ;;  %v441_v58 = vsub.f32 %v339_v33, %v2906_v48  ;;  %v2263_v33 = vld [vmem:[%s2696_s15 + $0x61] ss:$2 sm:$0xff] }
  0x58   : > { %1004 = vmatpush.msrb.mxu1 %v2734_v21  ;;  %v1499_v21 = vsub.f32 %v2890_v22, %v1498_v17  ;;  %v451_v40 = vsub.f32 %v449_v18, %v450_v34 }
  0x59   : > { %1601 = vmatpush.msra.mxu0 %v2793_v51  ;;  %586 = vmatmul.f32.gmra.mxu1 %v2809_v61  ;;  %v436_v63 = vand.u32 4294901760, %v435_v56  ;;  %v442_v1 = vand.u32 4294901760, %v441_v58 }
  0x5a   : > { %421 = vmatmul.f32.gmra.mxu0 %v420_v9  ;;  %1713 = vmatpush.msra.mxu1 %v2781_v44  ;;  %v1500_v54 = vand.u32 4294901760, %v1499_v21  ;;  %v452_v15 = vand.u32 4294901760, %v451_v40 }
  0x5b   : > { %1604 = vmatpush.msra.mxu0 %v2816_v0  ;;  %800 = vmatmul.f32.gmra.mxu3 %v418_v49  ;;  %v443_v13 = vsub.f32 %v441_v58, %v442_v1 }
  0x5c   : > { %691 = vmatmul.f32.gmra.mxu2 %v417_v23  ;;  %1715 = vmatpush.msra.mxu1 %v2803_v57  ;;  %v281_v23 = vld [vmem:[#allocation4 + $0x10] sm:$0xff] }
  0x5d   : > { %1607 = vmatpush.msra.mxu0 %v2850_v43  ;;  %1501 = vmatpush.msrb.mxu3 %v1500_v54  ;;  %v444_v32 = vand.u32 4294901760, %v443_v13  ;;  %v2942_v49 = vand.u32 4294901760, %v281_v23  ;;  %v280_v54 = vld [vmem:[#allocation4 + $0x8] sm:$0xff] }
  0x5e   : > { %1717 = vmatpush.msra.mxu1 %v2843_v45  ;;  %v2966_v60 = vand.u32 4294901760, %v280_v54 }
  0x5f   : > { %1610 = vmatpush.msra.mxu0 %v2890_v22  ;;  %1507 = vmatpush.msrb.mxu3 %v1506_v38  ;;  %v2947_v16 = vsub.f32 %v281_v23, %v2942_v49  ;;  %v279_v23 = vld [vmem:[#allocation4] sm:$0xff] }
  0x60   : > { %1719 = vmatpush.msra.mxu1 %v2882_v27  ;;  %1336 = vmatpush.msrb.mxu2 %v2942_v49 }
  0x61   : > { %590 = vmatmul.f32.gmra.mxu1 %v2841_v42  ;;  %1613 = vmatpush.msra.mxu0 %v2923_v8  ;;  %v1510_v53 = vand.u32 4294901760, %v2947_v16  ;;  %v2298_v8 = vld [vmem:[%s2696_s15 + $0x20] ss:$4 sm:$0xff] }
  0x62   : > { %429 = vmatmul.f32.gmra.mxu0 %v428_v36  ;;  %1721 = vmatpush.msra.mxu1 %v2918_v6  ;;  %v473_v36 = vsub.f32 %v351_v5, %v2958_v11 }
  0x63   : > { %806 = vmatmul.f32.gmra.mxu3 %v426_v19  ;;  %1616 = vmatpush.msra.mxu0 %v2947_v16  ;;  %v1511_v9 = vsub.f32 %v2947_v16, %v1510_v53  ;;  %v460_v19 = vand.u32 4294901760, %v459_v4  ;;  %v1339_v4 = vand.u32 4294901760, %v279_v23 }
  0x64   : > { %696 = vmatmul.f32.gmra.mxu2 %v425_v25  ;;  %1723 = vmatpush.msra.mxu1 %v2942_v49  ;;  %v465_v25 = vsub.f32 %v348_v14, %v2940_v47  ;;  %v474_v56 = vand.u32 4294901760, %v473_v36  ;;  %v360_v14 = vsel %vm319_vm0, %v2265_v39, 0  ;;  %v2300_v39 = vld [vmem:[%s2696_s15 + $0x60] ss:$4 sm:$0xff] }
  0x65   : > { %1338 = vmatpush.msrb.mxu2 %v2966_v60  ;;  %v2988_v3 = vand.u32 4294901760, %v360_v14  ;;  %v1521_v5 = vsub.f32 %v279_v23, %v1339_v4 }
  0x66   : > { %v466_v10 = vand.u32 4294901760, %v465_v25  ;;  %1725 = vmatpush.msra.mxu1 %v2966_v60 }
  0x67   : > { %1340 = vmatpush.msrb.mxu2 %v1339_v4 }
  0x68   : > { %v467_v21 = vsub.f32 %v465_v25, %v466_v10  ;;  %1727 = vmatpush.msra.mxu1 %v1339_v4 }
  0x69   : > { %594 = vmatmul.f32.gmra.mxu1 %v2864_v50  ;;  %1836 = vmatpush.msra.mxu2 %v1480_v59 }
  0x6a   : > { %437 = vmatmul.f32.gmra.mxu0 %v436_v63  ;;  %v468_v55 = vand.u32 4294901760, %v467_v21  ;;  %v2971_v63 = vsub.f32 %v280_v54, %v2966_v60 }
  0x6b   : > { %812 = vmatmul.f32.gmra.mxu3 %v434_v41  ;;  %v354_v41 = vsel %vm319_vm0, %v2263_v33, 0  ;;  %1840 = vmatpush.msra.mxu2 %v1486_v12 }
  0x6c   : > { %701 = vmatmul.f32.gmra.mxu2 %v433_v29  ;;  %v1512_v29 = vand.u32 4294901760, %v1511_v9  ;;  %v1516_v13 = vand.u32 4294901760, %v2971_v63  ;;  %1619 = vmatpush.msra.mxu0 %v2971_v63 }
  0x6d   : > { %1844 = vmatpush.msra.mxu2 %v1492_v46 }
  0x6e   : > { %1513 = vmatpush.msrb.mxu3 %v1512_v29  ;;  %v1517_v30 = vsub.f32 %v2971_v63, %v1516_v13  ;;  %1622 = vmatpush.msra.mxu0 %v1521_v5 }
  0x6f   : > { %1848 = vmatpush.msra.mxu2 %v1498_v17 }
  0x70   : > { %v1518_v38 = vand.u32 4294901760, %v1517_v30 }
  0x71   : > { %598 = vmatmul.f32.gmra.mxu1 %v2880_v20  ;;  %1852 = vmatpush.msra.mxu2 %v1504_v26  ;;  %v2306_v26 = vld [vmem:[%s2696_s15 + $0x22] ss:$4 sm:$0xff] }
  0x72   : > { %445 = vmatmul.f32.gmra.mxu0 %v444_v32  ;;  %1519 = vmatpush.msrb.mxu3 %v1518_v38 }
  0x73   : > { %818 = vmatmul.f32.gmra.mxu3 %v442_v1  ;;  %v475_v1 = vsub.f32 %v473_v36, %v474_v56  ;;  %1856 = vmatpush.msra.mxu2 %v1510_v53  ;;  %v1210_v53 = vadd.f32 %v2306_v26, %v2298_v8 }
  0x74   : > { %706 = vmatmul.f32.gmra.mxu2 %v441_v58  ;;  %v2964_v58 = vand.u32 4294901760, %v354_v41 }
  0x75   : > { %v476_v31 = vand.u32 4294901760, %v475_v1  ;;  %1860 = vmatpush.msra.mxu2 %v1516_v13  ;;  %v2299_v1 = vld [vmem:[%s2696_s15 + $0x40] ss:$4 sm:$0xff] }
  0x76   : > { %v481_v7 = vsub.f32 %v354_v41, %v2964_v58  ;;  %v2267_v41 = vld [vmem:[%s2696_s15 + $0xe1] ss:$2 sm:$0xff] }
  0x77   : > { %v366_v54 = vsel %vm319_vm0, %v2267_v41, 0 }
  0x78   : > { %v482_v32 = vand.u32 4294901760, %v481_v7  ;;  %v3015_v46 = vand.u32 4294901760, %v366_v54 }
  0x79   : > { %602 = vmatmul.f32.gmra.mxu1 %v2906_v48 }
  0x7a   : > { %453 = vmatmul.f32.gmra.mxu0 %v452_v15  ;;  %v483_v40 = vsub.f32 %v481_v7, %v482_v32 }
  0x7b   : > { %824 = vmatmul.f32.gmra.mxu3 %v450_v34 }
  0x7c   : > { %711 = vmatmul.f32.gmra.mxu2 %v449_v18  ;;  %v357_v18 = vsel %vm319_vm0, %v2264_v62, 0  ;;  %v484_v15 = vand.u32 4294901760, %v483_v40  ;;  %v2308_v40 = vld [vmem:[%s2696_s15 + $0x62] ss:$4 sm:$0xff] }
  0x7d   : > { %v2982_v34 = vand.u32 4294901760, %v357_v18 }
  0x81   : > { %606 = vmatmul.f32.gmra.mxu1 %v2916_v2 }
  0x82   : > { %461 = vmatmul.f32.gmra.mxu0 %v460_v19  ;;  %v497_v19 = vsub.f32 %v360_v14, %v2988_v3 }
  0x83   : > { %830 = vmatmul.f32.gmra.mxu3 %v458_v24 }
  0x84   : > { %716 = vmatmul.f32.gmra.mxu2 %v457_v35  ;;  %v489_v35 = vsub.f32 %v357_v18, %v2982_v34  ;;  %v498_v59 = vand.u32 4294901760, %v497_v19 }
  0x86   : > { %v490_v24 = vand.u32 4294901760, %v489_v35  ;;  %v499_v0 = vsub.f32 %v497_v19, %v498_v59 }
  0x88   : > { %v491_v9 = vsub.f32 %v489_v35, %v490_v24 }
  0x89   : > { %610 = vmatmul.f32.gmra.mxu1 %v2934_v37 }
  0x8a   : > { %469 = vmatmul.f32.gmra.mxu0 %v468_v55  ;;  %v492_v51 = vand.u32 4294901760, %v491_v9  ;;  %v1182_v55 = vld [vmem:[%s2696_s15] ss:$4 sm:$0xff] }
  0x8b   : > { %836 = vmatmul.f32.gmra.mxu3 %v466_v10  ;;  %v1522_v10 = vand.u32 4294901760, %v1521_v5 }
  0x8c   : > { %721 = vmatmul.f32.gmra.mxu2 %v465_v25  ;;  %v2266_v25 = vld [vmem:[%s2696_s15 + $0xd1] ss:$2 sm:$0xff] }
  0x8d   : > { %v363_v29 = vsel %vm319_vm0, %v2266_v25, 0  ;;  %v1523_v33 = vsub.f32 %v1521_v5, %v1522_v10  ;;  %1864 = vmatpush.msra.mxu2 %v1522_v10  ;;  %v2309_v10 = vld [vmem:[%s2696_s15 + $0x82] ss:$4 sm:$0xff] }
  0x8e   : > { %v2998_v21 = vand.u32 4294901760, %v363_v29 }
  0x90   : > { %v505_v12 = vsub.f32 %v363_v29, %v2998_v21 }
  0x91   : > { %614 = vmatmul.f32.gmra.mxu1 %v2940_v47 }
  0x92   : > { %477 = vmatmul.f32.gmra.mxu0 %v476_v31  ;;  %v506_v43 = vand.u32 4294901760, %v505_v12 }
  0x93   : > { %842 = vmatmul.f32.gmra.mxu3 %v474_v56  ;;  %v2305_v56 = vld [vmem:[%s2696_s15 + $0x2] ss:$4 sm:$0xff] }
  0x94   : > { %726 = vmatmul.f32.gmra.mxu2 %v473_v36  ;;  %v1524_v36 = vand.u32 4294901760, %v1523_v33  ;;  %v1209_v22 = vadd.f32 %v2305_v56, %v1182_v55 }
  0x96   : > { %1525 = vmatpush.msrb.mxu3 %v1524_v36  ;;  %v1217_v17 = vmul.f32 0.5, %v1209_v22 }
  0x98   : > { %1939 = vmatpush.msra.mxu3 %v2781_v44  ;;  %v500_v44 = vand.u32 4294901760, %v499_v0  ;;  %v1270_v16 = vsel %vm319_vm0, %v1217_v17, 0 }
  0x99   : > { %618 = vmatmul.f32.gmra.mxu1 %v2958_v11  ;;  %v3030_v62 = vand.u32 4294901760, %v1270_v16 }
  0x9a   : > { %485 = vmatmul.f32.gmra.mxu0 %v484_v15  ;;  %1941 = vmatpush.msra.mxu3 %v2803_v57  ;;  %v507_v57 = vsub.f32 %v505_v12, %v506_v43  ;;  %v1212_v15 = vadd.f32 %v2308_v40, %v2300_v39  ;;  %v2311_v39 = vld [vmem:[%s2696_s15 + $0xc2] ss:$4 sm:$0xff] }
  0x9b   : > { %848 = vmatmul.f32.gmra.mxu3 %v482_v32 }
  0x9c   : > { %731 = vmatmul.f32.gmra.mxu2 %v481_v7  ;;  %1943 = vmatpush.msra.mxu3 %v2843_v45  ;;  %v513_v45 = vsub.f32 %v366_v54, %v3015_v46  ;;  %v2307_v7 = vld [vmem:[%s2696_s15 + $0x42] ss:$4 sm:$0xff]  ;;  %v1220_v9 = vmul.f32 0.5, %v1212_v15 }
  0x9d   : > { %v1211_v30 = vadd.f32 %v2307_v7, %v2299_v1 }
  0x9e   : > { %1945 = vmatpush.msra.mxu3 %v2882_v27  ;;  %v508_v27 = vand.u32 4294901760, %v507_v57  ;;  %v2302_v57 = vld [vmem:[%s2696_s15 + $0xa0] ss:$4 sm:$0xff] }
  0x9f   : > { %v1219_v38 = vmul.f32 0.5, %v1211_v30 }
  0xa0   : > { %1947 = vmatpush.msra.mxu3 %v2918_v6  ;;  %v514_v6 = vand.u32 4294901760, %v513_v45 }
  0xa1   : > { %622 = vmatmul.f32.gmra.mxu1 %v2964_v58  ;;  %v1276_v23 = vsel %vm319_vm0, %v1219_v38, 0  ;;  %v2303_v38 = vld [vmem:[%s2696_s15 + $0xc0] ss:$4 sm:$0xff] }
  0xa2   : > { %493 = vmatmul.f32.gmra.mxu0 %v492_v51  ;;  %1949 = vmatpush.msra.mxu3 %v2942_v49  ;;  %v515_v63 = vsub.f32 %v513_v45, %v514_v6  ;;  %v1218_v49 = vmul.f32 0.5, %v1210_v53  ;;  %v3053_v5 = vand.u32 4294901760, %v1276_v23  ;;  %v1279_v51 = vsel %vm319_vm0, %v1220_v9, 0 }
  0xa3   : > { %854 = vmatmul.f32.gmra.mxu3 %v490_v24 }
  0xa4   : > { %736 = vmatmul.f32.gmra.mxu2 %v489_v35  ;;  %1951 = vmatpush.msra.mxu3 %v2966_v60  ;;  %v3036_v60 = vsub.f32 %v1270_v16, %v3030_v62  ;;  %v516_v13 = vand.u32 4294901760, %v515_v63  ;;  %v1273_v18 = vsel %vm319_vm0, %v1218_v49, 0  ;;  %v3064_v33 = vsub.f32 %v1276_v23, %v3053_v5 }
  0xa5   : > { %v3040_v32 = vand.u32 4294901760, %v1273_v18 }
  0xa6   : > { %1953 = vmatpush.msra.mxu3 %v1339_v4  ;;  %v1343_v31 = vand.u32 4294901760, %v3036_v60  ;;  %v3653_v56 = vand.u32 4294901760, %v3064_v33 }
  0xa7   : > { %v3049_v14 = vsub.f32 %v1273_v18, %v3040_v32 }
  0xa8   : > { %v1344_v35 = vsub.f32 %v3036_v60, %v1343_v31  ;;  %v1360_v8 = vsub.f32 %v3064_v33, %v3653_v56 }
  0xa9   : > { %626 = vmatmul.f32.gmra.mxu1 %v2982_v34  ;;  %v1351_v25 = vand.u32 4294901760, %v3049_v14 }
  0xaa   : > { %501 = vmatmul.f32.gmra.mxu0 %v500_v44  ;;  %v1345_v4 = vand.u32 4294901760, %v1344_v35  ;;  %v3068_v44 = vand.u32 4294901760, %v1279_v51  ;;  %v1361_v1 = vand.u32 4294901760, %v1360_v8 }
  0xab   : > { %860 = vmatmul.f32.gmra.mxu3 %v498_v59  ;;  %v1352_v29 = vsub.f32 %v3049_v14, %v1351_v25 }
  0xac   : > { %741 = vmatmul.f32.gmra.mxu2 %v497_v19  ;;  %v2301_v19 = vld [vmem:[%s2696_s15 + $0x80] ss:$4 sm:$0xff]  ;;  %v3081_v26 = vsub.f32 %v1279_v51, %v3068_v44 }
  0xad   : > { %v1213_v59 = vadd.f32 %v2309_v10, %v2301_v19  ;;  %v1353_v55 = vand.u32 4294901760, %v1352_v29 }
  0xae   : > { %v3652_v7 = vand.u32 4294901760, %v3081_v26 }
  0xaf   : > { %v1221_v22 = vmul.f32 0.5, %v1213_v59 }
  0xb0   : > { %v1368_v35 = vsub.f32 %v3081_v26, %v3652_v7  ;;  %v2328_v7 = vld [vmem:[%s2696_s15 + $0xe3] ss:$4 sm:$0xff] }
  0xb1   : > { %630 = vmatmul.f32.gmra.mxu1 %v2988_v3 }
  0xb2   : > { %509 = vmatmul.f32.gmra.mxu0 %v508_v27  ;;  %v1282_v27 = vsel %vm319_vm0, %v1221_v22, 0  ;;  %v1369_v29 = vand.u32 4294901760, %v1368_v35 }
  0xb3   : > { %866 = vmatmul.f32.gmra.mxu3 %v506_v43 }
  0xb4   : > { %746 = vmatmul.f32.gmra.mxu2 %v505_v12 }
  0xb9   : > { %634 = vmatmul.f32.gmra.mxu1 %v2998_v21 }
  0xba   : > { %517 = vmatmul.f32.gmra.mxu0 %v516_v13  ;;  %v3085_v13 = vand.u32 4294901760, %v1282_v27 }
  0xbb   : > { %872 = vmatmul.f32.gmra.mxu3 %v514_v6 }
  0xbc   : > { %751 = vmatmul.f32.gmra.mxu2 %v513_v45  ;;  %v2310_v45 = vld [vmem:[%s2696_s15 + $0xa2] ss:$4 sm:$0xff]  ;;  %v3098_v23 = vsub.f32 %v1282_v27, %v3085_v13 }
  0xbe   : > { %v398_v24 = vpop.f32.mrf.mxu0  ;;  %v3650_v51 = vand.u32 4294901760, %v3098_v23 }
  0xc1   : > { %638 = vmatmul.f32.gmra.mxu1 %v3015_v46 }
  0xc2   : > { %917 = vmatmul.f32.vlgmr.msrb.gmra.mxu0 %v2747_v28 }
  0xc3   : > { %1527 = vmatmul.f32.vlgmr.msrb.gmra.mxu3 %v3030_v62 }
  0xc4   : > { %1346 = vmatmul.f32.vlgmr.msrb.gmra.mxu2 %v1345_v4 }
  0xc6   : > { %v406_v36 = vpop.f32.mrf.mxu0  ;;  %v579_v41 = vpop.f32.mrf.mxu1 }
  0xc7   : > { %v580_v0 = vadd.f32 %v579_v41, %v398_v24  ;;  %v677_v12 = vpop.f32.mrf.mxu2  ;;  %v783_v54 = vpop.f32.mrf.mxu3 }
  0xc9   : > { %v678_v43 = vadd.f32 %v677_v12, %v580_v0  ;;  %1006 = vmatmul.f32.vlgmr.msrb.gmra.mxu1 %v2747_v28  ;;  %v1214_v28 = vadd.f32 %v2310_v45, %v2302_v57  ;;  %v2304_v0 = vld [vmem:[%s2696_s15 + $0xe0] ss:$4 sm:$0xff]  ;;  %v2312_v12 = vld [vmem:[%s2696_s15 + $0xe2] ss:$4 sm:$0xff] }
  0xca   : > { %921 = vmatmul.f32.gmra.mxu0 %v2795_v52 }
  0xcb   : > { %v3074_v17 = vadd.f32 %v783_v54, %v678_v43  ;;  %1531 = vmatmul.f32.gmra.mxu3 %v3040_v32  ;;  %v1222_v30 = vmul.f32 0.5, %v1214_v28 }
  0xcc   : > { %1354 = vmatmul.f32.gmra.mxu2 %v1353_v55  ;;  %v1376_v55 = vsub.f32 %v3098_v23, %v3650_v51 }
  0xcd   : > { %v1285_v15 = vsel %vm319_vm0, %v1222_v30, 0 }
  0xce   : > { %v414_v6 = vpop.f32.mrf.mxu0  ;;  %v583_v16 = vpop.f32.mrf.mxu1  ;;  %v3102_v59 = vand.u32 4294901760, %v1285_v15 }
  0xcf   : > { %v584_v53 = vadd.f32 %v583_v16, %v406_v36  ;;  %v682_v63 = vpop.f32.mrf.mxu2  ;;  %v789_v49 = vpop.f32.mrf.mxu3 }
  0xd0   : > { %v3115_v43 = vsub.f32 %v1285_v15, %v3102_v59 }
  0xd1   : > { %v683_v18 = vadd.f32 %v682_v63, %v584_v53  ;;  %1010 = vmatmul.f32.gmra.mxu1 %v2795_v52  ;;  %v1215_v52 = vadd.f32 %v2311_v39, %v2303_v38 }
  0xd2   : > { %925 = vmatmul.f32.gmra.mxu0 %v2809_v61  ;;  %v3649_v16 = vand.u32 4294901760, %v3115_v43 }
  0xd3   : > { %v3091_v40 = vadd.f32 %v789_v49, %v683_v18  ;;  %1535 = vmatmul.f32.gmra.mxu3 %v3053_v5  ;;  %v1223_v41 = vmul.f32 0.5, %v1215_v52  ;;  %v2321_v18 = vld [vmem:[%s2696_s15 + $0x3] ss:$4 sm:$0xff] }
  0xd4   : > { %1362 = vmatmul.f32.gmra.mxu2 %v1361_v1  ;;  %v2313_v1 = vld [vmem:[%s2696_s15 + $0x1] ss:$4 sm:$0xff]  ;;  %v1384_v38 = vsub.f32 %v3115_v43, %v3649_v16  ;;  %v2327_v16 = vld [vmem:[%s2696_s15 + $0xc3] ss:$4 sm:$0xff] }
  0xd5   : > { %v1288_v22 = vsel %vm319_vm0, %v1223_v41, 0 }
  0xd6   : > { %v587_v4 = vpop.f32.mrf.mxu1  ;;  %v3119_v53 = vand.u32 4294901760, %v1288_v22 }
  0xd7   : > { %v422_v24 = vpop.f32.mrf.mxu0  ;;  %v588_v9 = vadd.f32 %v587_v4, %v414_v6  ;;  %v687_v19 = vpop.f32.mrf.mxu2  ;;  %v1377_v6 = vand.u32 4294901760, %v1376_v55 }
  0xd8   : > { %v795_v10 = vpop.f32.mrf.mxu3  ;;  %v3132_v39 = vsub.f32 %v1288_v22, %v3119_v53 }
  0xd9   : > { %v688_v36 = vadd.f32 %v687_v19, %v588_v9  ;;  %1014 = vmatmul.f32.gmra.mxu1 %v2809_v61  ;;  %v1216_v61 = vadd.f32 %v2312_v12, %v2304_v0  ;;  %v1385_v19 = vand.u32 4294901760, %v1384_v38  ;;  %v2314_v0 = vld [vmem:[%s2696_s15 + $0x21] ss:$4 sm:$0xff]  ;;  %v2322_v12 = vld [vmem:[%s2696_s15 + $0x23] ss:$4 sm:$0xff] }
  0xda   : > { %929 = vmatmul.f32.gmra.mxu0 %v2841_v42 }
  0xdb   : > { %v3108_v54 = vadd.f32 %v795_v10, %v688_v36  ;;  %1539 = vmatmul.f32.gmra.mxu3 %v3068_v44  ;;  %v1224_v49 = vmul.f32 0.5, %v1216_v61  ;;  %v3647_v10 = vand.u32 4294901760, %v3132_v39 }
  0xdc   : > { %1370 = vmatmul.f32.gmra.mxu2 %v1369_v29 }
  0xdd   : > { %v1291_v35 = vsel %vm319_vm0, %v1224_v49, 0  ;;  %v1392_v22 = vsub.f32 %v3132_v39, %v3647_v10 }
  0xde   : > { %v591_v45 = vpop.f32.mrf.mxu1  ;;  %v3136_v29 = vand.u32 4294901760, %v1291_v35 }
  0xdf   : > { %v430_v57 = vpop.f32.mrf.mxu0  ;;  %v592_v8 = vadd.f32 %v591_v45, %v422_v24  ;;  %v692_v27 = vpop.f32.mrf.mxu2 }
  0xe0   : > { %v801_v28 = vpop.f32.mrf.mxu3  ;;  %v3149_v61 = vsub.f32 %v1291_v35, %v3136_v29  ;;  %v2315_v35 = vld [vmem:[%s2696_s15 + $0x41] ss:$4 sm:$0xff] }
  0xe1   : > { %v693_v63 = vadd.f32 %v692_v27, %v592_v8  ;;  %1018 = vmatmul.f32.gmra.mxu1 %v2841_v42  ;;  %v1253_v42 = vadd.f32 %v2321_v18, %v2313_v1 }
  0xe2   : > { %933 = vmatmul.f32.gmra.mxu0 %v2864_v50  ;;  %v3646_v49 = vand.u32 4294901760, %v3149_v61 }
  0xe3   : > { %v3125_v30 = vadd.f32 %v801_v28, %v693_v63  ;;  %1543 = vmatmul.f32.gmra.mxu3 %v3085_v13  ;;  %v1261_v41 = vmul.f32 0.5, %v1253_v42  ;;  %v1393_v63 = vand.u32 4294901760, %v1392_v22  ;;  %v2323_v42 = vld [vmem:[%s2696_s15 + $0x43] ss:$4 sm:$0xff] }
  0xe4   : > { %1378 = vmatmul.f32.gmra.mxu2 %v1377_v6 }
  0xe6   : > { %v595_v52 = vpop.f32.mrf.mxu1 }
  0xe7   : > { %v438_v15 = vpop.f32.mrf.mxu0  ;;  %v596_v24 = vadd.f32 %v595_v52, %v430_v57  ;;  %v697_v4 = vpop.f32.mrf.mxu2  ;;  %v1294_v57 = vsel %vm319_vm0, %v1261_v41, 0 }
  0xe8   : > { %v807_v9 = vpop.f32.mrf.mxu3  ;;  %v3153_v1 = vand.u32 4294901760, %v1294_v57 }
  0xe9   : > { %v698_v36 = vadd.f32 %v697_v4, %v596_v24  ;;  %1022 = vmatmul.f32.gmra.mxu1 %v2864_v50  ;;  %v1254_v50 = vadd.f32 %v2322_v12, %v2314_v0 }
  0xea   : > { %937 = vmatmul.f32.gmra.mxu0 %v2880_v20  ;;  %v3166_v24 = vsub.f32 %v1294_v57, %v3153_v1 }
  0xeb   : > { %v3142_v55 = vadd.f32 %v807_v9, %v698_v36  ;;  %1547 = vmatmul.f32.gmra.mxu3 %v3102_v59  ;;  %v1262_v38 = vmul.f32 0.5, %v1254_v50 }
  0xec   : > { %1386 = vmatmul.f32.gmra.mxu2 %v1385_v19  ;;  %v3644_v22 = vand.u32 4294901760, %v3166_v24 }
  0xed   : > { %v1297_v4 = vsel %vm319_vm0, %v1262_v38, 0 }
  0xee   : > { %v599_v8 = vpop.f32.mrf.mxu1  ;;  %v3170_v50 = vand.u32 4294901760, %v1297_v4 }
  0xef   : > { %v446_v45 = vpop.f32.mrf.mxu0  ;;  %v600_v27 = vadd.f32 %v599_v8, %v438_v15  ;;  %v702_v28 = vpop.f32.mrf.mxu2  ;;  %v1400_v15 = vsub.f32 %v3149_v61, %v3646_v49  ;;  %v2326_v49 = vld [vmem:[%s2696_s15 + $0xa3] ss:$4 sm:$0xff] }
  0xf0   : > { %v813_v6 = vpop.f32.mrf.mxu3 }
  0xf1   : > { %v703_v18 = vadd.f32 %v702_v28, %v600_v27  ;;  %1026 = vmatmul.f32.gmra.mxu1 %v2880_v20  ;;  %v1255_v20 = vadd.f32 %v2323_v42, %v2315_v35  ;;  %v1401_v12 = vand.u32 4294901760, %v1400_v15  ;;  %v2316_v27 = vld [vmem:[%s2696_s15 + $0x61] ss:$4 sm:$0xff]  ;;  %v2324_v28 = vld [vmem:[%s2696_s15 + $0x63] ss:$4 sm:$0xff] }
  0xf2   : > { %941 = vmatmul.f32.gmra.mxu0 %v2906_v48 }
  0xf3   : > { %v3159_v52 = vadd.f32 %v813_v6, %v703_v18  ;;  %1551 = vmatmul.f32.gmra.mxu3 %v3119_v53  ;;  %v1263_v57 = vmul.f32 0.5, %v1255_v20 }
  0xf4   : > { %1394 = vmatmul.f32.gmra.mxu2 %v1393_v63  ;;  %v3183_v63 = vsub.f32 %v1297_v4, %v3170_v50 }
  0xf5   : > { %v1300_v18 = vsel %vm319_vm0, %v1263_v57, 0 }
  0xf6   : > { %v603_v19 = vpop.f32.mrf.mxu1 }
  0xf7   : > { %v454_v9 = vpop.f32.mrf.mxu0  ;;  %v604_v36 = vadd.f32 %v603_v19, %v446_v45  ;;  %v707_v41 = vpop.f32.mrf.mxu2  ;;  %v1408_v45 = vsub.f32 %v3166_v24, %v3644_v22 }
  0xf8   : > { %v819_v0 = vpop.f32.mrf.mxu3 }
  0xf9   : > { %v708_v8 = vadd.f32 %v707_v41, %v604_v36  ;;  %1030 = vmatmul.f32.gmra.mxu1 %v2906_v48  ;;  %v1256_v48 = vadd.f32 %v2324_v28, %v2316_v27  ;;  %v1409_v19 = vand.u32 4294901760, %v1408_v45  ;;  %v3645_v36 = vand.u32 4294901760, %v3183_v63 }
  0xfa   : > { %945 = vmatmul.f32.gmra.mxu0 %v2916_v2  ;;  %v3187_v41 = vand.u32 4294901760, %v1300_v18 }
  0xfb   : > { %v3176_v6 = vadd.f32 %v819_v0, %v708_v8  ;;  %1555 = vmatmul.f32.gmra.mxu3 %v3136_v29  ;;  %v1264_v4 = vmul.f32 0.5, %v1256_v48  ;;  %v2325_v8 = vld [vmem:[%s2696_s15 + $0x83] ss:$4 sm:$0xff] }
  0xfc   : > { %1402 = vmatmul.f32.gmra.mxu2 %v1401_v12  ;;  %v2317_v12 = vld [vmem:[%s2696_s15 + $0x81] ss:$4 sm:$0xff]  ;;  %v3200_v27 = vsub.f32 %v1300_v18, %v3187_v41 }
  0xfd   : > { %v1303_v28 = vsel %vm319_vm0, %v1264_v4, 0 }
  0xfe   : > { %v607_v35 = vpop.f32.mrf.mxu1 }
  0xff   : > { %v462_v38 = vpop.f32.mrf.mxu0  ;;  %v608_v42 = vadd.f32 %v607_v35, %v454_v9  ;;  %v712_v15 = vpop.f32.mrf.mxu2  ;;  %v1416_v9 = vsub.f32 %v3183_v63, %v3645_v36  ;;  %v2318_v36 = vld [vmem:[%s2696_s15 + $0xa1] ss:$4 sm:$0xff] }
 0x100   : > { %v825_v20 = vpop.f32.mrf.mxu3 }
 0x101   : > { %v713_v0 = vadd.f32 %v712_v15, %v608_v42  ;;  %1034 = vmatmul.f32.gmra.mxu1 %v2916_v2  ;;  %v1257_v2 = vadd.f32 %v2325_v8, %v2317_v12 }
 0x102   : > { %949 = vmatmul.f32.gmra.mxu0 %v2934_v37 }
 0x103   : > { %v3193_v57 = vadd.f32 %v825_v20, %v713_v0  ;;  %1559 = vmatmul.f32.gmra.mxu3 %v3153_v1  ;;  %v1417_v20 = vand.u32 4294901760, %v1416_v9  ;;  %v3204_v0 = vand.u32 4294901760, %v1303_v28  ;;  %v1265_v18 = vmul.f32 0.5, %v1257_v2 }
 0x104   : > { %1410 = vmatmul.f32.gmra.mxu2 %v1409_v19  ;;  %v3648_v19 = vand.u32 4294901760, %v3200_v27 }
 0x105   : > { %v3217_v12 = vsub.f32 %v1303_v28, %v3204_v0  ;;  %v1306_v8 = vsel %vm319_vm0, %v1265_v18, 0 }
 0x106   : > { %v611_v48 = vpop.f32.mrf.mxu1 }
 0x107   : > { %v470_v45 = vpop.f32.mrf.mxu0  ;;  %v612_v35 = vadd.f32 %v611_v48, %v462_v38  ;;  %v717_v42 = vpop.f32.mrf.mxu2  ;;  %v1424_v38 = vsub.f32 %v3200_v27, %v3648_v19  ;;  %v2319_v19 = vld [vmem:[%s2696_s15 + $0xc1] ss:$4 sm:$0xff] }
 0x108   : > { %v831_v15 = vpop.f32.mrf.mxu3 }
 0x109   : > { %v718_v22 = vadd.f32 %v717_v42, %v612_v35  ;;  %1038 = vmatmul.f32.gmra.mxu1 %v2934_v37  ;;  %v1258_v37 = vadd.f32 %v2326_v49, %v2318_v36  ;;  %v1425_v42 = vand.u32 4294901760, %v1424_v38 }
 0x10a   : > { %953 = vmatmul.f32.gmra.mxu0 %v2940_v47 }
 0x10b   : > { %v3210_v4 = vadd.f32 %v831_v15, %v718_v22  ;;  %1563 = vmatmul.f32.gmra.mxu3 %v3170_v50  ;;  %v3651_v15 = vand.u32 4294901760, %v3217_v12  ;;  %v1266_v28 = vmul.f32 0.5, %v1258_v37 }
 0x10c   : > { %1418 = vmatmul.f32.gmra.mxu2 %v1417_v20  ;;  %v3221_v20 = vand.u32 4294901760, %v1306_v8 }
 0x10d   : > { %v1432_v49 = vsub.f32 %v3217_v12, %v3651_v15  ;;  %v2320_v15 = vld [vmem:[%s2696_s15 + $0xe1] ss:$4 sm:$0xff] }
 0x10e   : > { %v615_v2 = vpop.f32.mrf.mxu1  ;;  %v3234_v36 = vsub.f32 %v1306_v8, %v3221_v20 }
 0x10f   : > { %v478_v9 = vpop.f32.mrf.mxu0  ;;  %v616_v48 = vadd.f32 %v615_v2, %v470_v45  ;;  %v722_v22 = vpop.f32.mrf.mxu2  ;;  %v1309_v45 = vsel %vm319_vm0, %v1266_v28, 0 }
 0x110   : > { %v837_v35 = vpop.f32.mrf.mxu3 }
 0x111   : > { %v723_v10 = vadd.f32 %v722_v22, %v616_v48  ;;  %1042 = vmatmul.f32.gmra.mxu1 %v2940_v47  ;;  %v1259_v47 = vadd.f32 %v2327_v16, %v2319_v19  ;;  %v1433_v22 = vand.u32 4294901760, %v1432_v49  ;;  %v1260_v49 = vadd.f32 %v2328_v7, %v2320_v15 }
 0x112   : > { %957 = vmatmul.f32.gmra.mxu0 %v2958_v11 }
 0x113   : > { %v3227_v18 = vadd.f32 %v837_v35, %v723_v10  ;;  %1567 = vmatmul.f32.gmra.mxu3 %v3187_v41  ;;  %v3654_v35 = vand.u32 4294901760, %v3234_v36  ;;  %v1267_v8 = vmul.f32 0.5, %v1259_v47 }
 0x114   : > { %1426 = vmatmul.f32.gmra.mxu2 %v1425_v42  ;;  %v3238_v42 = vand.u32 4294901760, %v1309_v45 }
 0x115   : > { %v1440_v16 = vsub.f32 %v3234_v36, %v3654_v35 }
 0x116   : > { %v619_v37 = vpop.f32.mrf.mxu1  ;;  %v3251_v19 = vsub.f32 %v1309_v45, %v3238_v42  ;;  %v1268_v45 = vmul.f32 0.5, %v1260_v49 }
 0x117   : > { %v486_v38 = vpop.f32.mrf.mxu0  ;;  %v620_v2 = vadd.f32 %v619_v37, %v478_v9  ;;  %v727_v10 = vpop.f32.mrf.mxu2  ;;  %v1312_v9 = vsel %vm319_vm0, %v1267_v8, 0 }
 0x118   : > { %v843_v48 = vpop.f32.mrf.mxu3  ;;  %v3255_v56 = vand.u32 4294901760, %v1312_v9 }
 0x119   : > { %v728_v51 = vadd.f32 %v727_v10, %v620_v2  ;;  %1046 = vmatmul.f32.gmra.mxu1 %v2958_v11 }
 0x11a   : > { %961 = vmatmul.f32.gmra.mxu0 %v2964_v58  ;;  %v3266_v15 = vsub.f32 %v1312_v9, %v3255_v56 }
 0x11b   : > { %v3244_v28 = vadd.f32 %v843_v48, %v728_v51  ;;  %1571 = vmatmul.f32.gmra.mxu3 %v3204_v0  ;;  %v1441_v51 = vand.u32 4294901760, %v1440_v16  ;;  %v3655_v48 = vand.u32 4294901760, %v3251_v19 }
 0x11c   : > { %1434 = vmatmul.f32.gmra.mxu2 %v1433_v22 }
 0x11d   : > { %v1448_v7 = vsub.f32 %v3251_v19, %v3655_v48 }
 0x11e   : > { %v623_v11 = vpop.f32.mrf.mxu1 }
 0x11f   : > { %v494_v37 = vpop.f32.mrf.mxu0  ;;  %v624_v47 = vadd.f32 %v623_v11, %v486_v38  ;;  %v732_v2 = vpop.f32.mrf.mxu2  ;;  %v1315_v38 = vsel %vm319_vm0, %v1268_v45, 0  ;;  %v1449_v49 = vand.u32 4294901760, %v1448_v7 }
 0x120   : > { %v849_v10 = vpop.f32.mrf.mxu3 }
 0x121   : > { %v733_v22 = vadd.f32 %v732_v2, %v624_v47  ;;  %1050 = vmatmul.f32.gmra.mxu1 %v2964_v58  ;;  %v3656_v2 = vand.u32 4294901760, %v3266_v15 }
 0x122   : > { %965 = vmatmul.f32.gmra.mxu0 %v2982_v34 }
 0x123   : > { %v3259_v35 = vadd.f32 %v849_v10, %v733_v22  ;;  %1575 = vmatmul.f32.gmra.mxu3 %v3221_v20  ;;  %v3270_v10 = vand.u32 4294901760, %v1315_v38  ;;  %v1456_v9 = vsub.f32 %v3266_v15, %v3656_v2 }
 0x124   : > { %1442 = vmatmul.f32.gmra.mxu2 %v1441_v51 }
 0x125   : > { %v1457_v48 = vand.u32 4294901760, %v1456_v9 }
 0x126   : > { %v627_v16 = vpop.f32.mrf.mxu1 }
 0x127   : > { %v502_v8 = vpop.f32.mrf.mxu0  ;;  %v628_v11 = vadd.f32 %v627_v16, %v494_v37  ;;  %v737_v47 = vpop.f32.mrf.mxu2  ;;  %v3281_v37 = vsub.f32 %v1315_v38, %v3270_v10 }
 0x128   : > { %v855_v58 = vpop.f32.mrf.mxu3 }
 0x129   : > { %v738_v51 = vadd.f32 %v737_v47, %v628_v11  ;;  %1054 = vmatmul.f32.gmra.mxu1 %v2982_v34  ;;  %v1463_v34 = vand.u32 4294901760, %v3281_v37 }
 0x12a   : > { %969 = vmatmul.f32.gmra.mxu0 %v2988_v3 }
 0x12b   : > { %v3274_v22 = vadd.f32 %v855_v58, %v738_v51  ;;  %1579 = vmatmul.f32.gmra.mxu3 %v3238_v42  ;;  %v1464_v38 = vsub.f32 %v3281_v37, %v1463_v34 }
 0x12c   : > { %1450 = vmatmul.f32.gmra.mxu2 %v1449_v49 }
 0x12e   : > { %v631_v7 = vpop.f32.mrf.mxu1 }
 0x12f   : > { %v510_v45 = vpop.f32.mrf.mxu0  ;;  %v632_v16 = vadd.f32 %v631_v7, %v502_v8  ;;  %v742_v11 = vpop.f32.mrf.mxu2 }
 0x130   : > { %v861_v47 = vpop.f32.mrf.mxu3 }
 0x131   : > { %v743_v58 = vadd.f32 %v742_v11, %v632_v16  ;;  %1058 = vmatmul.f32.gmra.mxu1 %v2988_v3  ;;  %v1465_v11 = vand.u32 4294901760, %v1464_v38 }
 0x132   : > { %973 = vmatmul.f32.gmra.mxu0 %v2998_v21 }
 0x133   : > { %v3286_v49 = vadd.f32 %v861_v47, %v743_v58  ;;  %1583 = vmatmul.f32.gmra.mxu3 %v3255_v56 }
 0x134   : > { %1458 = vmatmul.f32.gmra.mxu2 %v1457_v48 }
 0x136   : > { %v635_v51 = vpop.f32.mrf.mxu1 }
 0x137   : > { %v518_v8 = vpop.f32.mrf.mxu0  ;;  %v636_v9 = vadd.f32 %v635_v51, %v510_v45  ;;  %v747_v7 = vpop.f32.mrf.mxu2 }
 0x138   : > { %v867_v16 = vpop.f32.mrf.mxu3 }
 0x139   : > { %v748_v2 = vadd.f32 %v747_v7, %v636_v9  ;;  %1062 = vmatmul.f32.gmra.mxu1 %v2998_v21 }
 0x13a   : > { %977 = vmatmul.f32.gmra.mxu0 %v3015_v46 }
 0x13b   : > { %v3295_v3 = vadd.f32 %v867_v16, %v748_v2  ;;  %1587 = vmatmul.f32.gmra.mxu3 %v3270_v10 }
 0x13c   : > { %1466 = vmatmul.f32.gmra.mxu2 %v1465_v11 }
 0x13e   : > { %v639_v48 = vpop.f32.mrf.mxu1 }
 0x13f   : > { %v918_v47 = vpop.f32.mrf.mxu0  ;;  %v640_v45 = vadd.f32 %v639_v48, %v518_v8  ;;  %v752_v58 = vpop.f32.mrf.mxu2 }
 0x140   : > { %v873_v51 = vpop.f32.mrf.mxu3  ;;  %v919_v2 = vadd.f32 %v918_v47, %v3074_v17 }
 0x141   : > { %v753_v38 = vadd.f32 %v752_v58, %v640_v45  ;;  %1066 = vmatmul.f32.gmra.mxu1 %v3015_v46 }
 0x142   : > { %1625 = vmatmul.f32.vlgmr.msra.gmra.mxu0 %v3036_v60 }
 0x143   : > { %v3304_v21 = vadd.f32 %v873_v51, %v753_v38  ;;  %1955 = vmatmul.f32.vlgmr.msra.gmra.mxu3 %v3030_v62 }
 0x144   : > { %1866 = vmatmul.f32.vlgmr.msra.gmra.mxu2 %v3030_v62 }
 0x146   : > { %v1007_v7 = vpop.f32.mrf.mxu1 }
 0x147   : > { %v922_v9 = vpop.f32.mrf.mxu0  ;;  %v1347_v46 = vpop.f32.mrf.mxu2  ;;  %v1008_v16 = vadd.f32 %v1007_v7, %v919_v2 }
 0x148   : > { %v1528_v8 = vpop.f32.mrf.mxu3  ;;  %v923_v62 = vadd.f32 %v922_v9, %v3091_v40 }
 0x149   : > { %v3314_v11 = vadd.f32 %v1528_v8, %v1347_v46  ;;  %1731 = vmatmul.f32.vlgmr.msra.gmra.mxu1 %v1343_v31  ;;  %1071 = vst.msk [vmem:[%s3312_s23] sm:$0xff] %vm1070_vm1, %v1008_v16  ;;  %1084 = vrot.lane.b32.xlu0 %v1008_v16, %s2571_s25 }
 0x14a   : > { %1630 = vmatmul.f32.gmra.mxu0 %v3049_v14  ;;  %v3660_v14 = vand.u32 4294901760, %v3064_v33 }
 0x14b   : > { %1959 = vmatmul.f32.gmra.mxu3 %v3040_v32 }
 0x14c   : > { %1870 = vmatmul.f32.gmra.mxu2 %v3040_v32 }
 0x14e   : > { %v1011_v48 = vpop.f32.mrf.mxu1 }
 0x14f   : > { %v926_v17 = vpop.f32.mrf.mxu0  ;;  %v1012_v47 = vadd.f32 %v1011_v48, %v923_v62  ;;  %v1355_v45 = vpop.f32.mrf.mxu2 }
 0x150   : > { %v1532_v58 = vpop.f32.mrf.mxu3  ;;  %v927_v60 = vadd.f32 %v926_v17, %v3108_v54 }
 0x151   : > { %v3325_v51 = vadd.f32 %v1532_v58, %v1355_v45  ;;  %1072 = vst.msk [vmem:[%s3312_s23 + $0x8] sm:$0xff] %vm1070_vm1, %v1012_v47  ;;  %1737 = vmatmul.f32.gmra.mxu1 %v1351_v25  ;;  %1086 = vrot.lane.b32.xlu0 %v1012_v47, %s2571_s25 }
 0x152   : > { %1635 = vmatmul.f32.gmra.mxu0 %v3064_v33  ;;  %v3661_v33 = vand.u32 4294901760, %v3081_v26 }
 0x153   : > { %1963 = vmatmul.f32.gmra.mxu3 %v3053_v5 }
 0x154   : > { %1874 = vmatmul.f32.gmra.mxu2 %v3053_v5 }
 0x156   : > { %v1015_v32 = vpop.f32.mrf.mxu1 }
 0x157   : > { %v930_v31 = vpop.f32.mrf.mxu0  ;;  %v1363_v40 = vpop.f32.mrf.mxu2  ;;  %v1016_v2 = vadd.f32 %v1015_v32, %v927_v60 }
 0x158   : > { %v1536_v38 = vpop.f32.mrf.mxu3  ;;  %v931_v25 = vadd.f32 %v930_v31, %v3125_v30 }
 0x159   : > { %v3336_v9 = vadd.f32 %v1536_v38, %v1363_v40  ;;  %1743 = vmatmul.f32.gmra.mxu1 %v3660_v14  ;;  %2268 = vst.msk [vmem:[%s3312_s23 + $0x40] sm:$0xff] %vm1070_vm1, %v1016_v2  ;;  %1095 = vrot.lane.b32.xlu1 %v1016_v2, %s2571_s25 }
 0x15a   : > { %1640 = vmatmul.f32.gmra.mxu0 %v3081_v26  ;;  %v3662_v26 = vand.u32 4294901760, %v3098_v23 }
 0x15b   : > { %1967 = vmatmul.f32.gmra.mxu3 %v3068_v44 }
 0x15c   : > { %1878 = vmatmul.f32.gmra.mxu2 %v3068_v44 }
 0x15e   : > { %v1019_v54 = vpop.f32.mrf.mxu1 }
 0x15f   : > { %v934_v5 = vpop.f32.mrf.mxu0  ;;  %v1020_v7 = vadd.f32 %v1019_v54, %v931_v25  ;;  %v1371_v46 = vpop.f32.mrf.mxu2 }
 0x160   : > { %v1540_v8 = vpop.f32.mrf.mxu3  ;;  %v935_v44 = vadd.f32 %v934_v5, %v3142_v55 }
 0x161   : > { %v3347_v16 = vadd.f32 %v1540_v8, %v1371_v46  ;;  %2269 = vst.msk [vmem:[%s3312_s23 + $0x48] sm:$0xff] %vm1070_vm1, %v1020_v7  ;;  %1749 = vmatmul.f32.gmra.mxu1 %v3661_v33  ;;  %1097 = vrot.lane.b32.xlu1 %v1020_v7, %s2571_s25 }
 0x162   : > { %1645 = vmatmul.f32.gmra.mxu0 %v3098_v23  ;;  %v3663_v23 = vand.u32 4294901760, %v3115_v43 }
 0x163   : > { %1971 = vmatmul.f32.gmra.mxu3 %v3085_v13 }
 0x164   : > { %1882 = vmatmul.f32.gmra.mxu2 %v3085_v13 }
 0x166   : > { %v1023_v62 = vpop.f32.mrf.mxu1 }
 0x167   : > { %v938_v30 = vpop.f32.mrf.mxu0  ;;  %v1379_v17 = vpop.f32.mrf.mxu2  ;;  %v1024_v47 = vadd.f32 %v1023_v62, %v935_v44 }
 0x168   : > { %v1544_v48 = vpop.f32.mrf.mxu3  ;;  %v939_v13 = vadd.f32 %v938_v30, %v3159_v52 }
 0x169   : > { %v3358_v45 = vadd.f32 %v1544_v48, %v1379_v17  ;;  %1755 = vmatmul.f32.gmra.mxu1 %v3662_v26  ;;  %2270 = vst.msk [vmem:[%s3312_s23 + $0x80] sm:$0xff] %vm1070_vm1, %v1024_v47  ;;  %1106 = vrot.lane.b32.xlu2 %v1024_v47, %s2571_s25 }
 0x16a   : > { %1650 = vmatmul.f32.gmra.mxu0 %v3115_v43  ;;  %v3664_v43 = vand.u32 4294901760, %v3132_v39 }
 0x16b   : > { %1975 = vmatmul.f32.gmra.mxu3 %v3102_v59 }
 0x16c   : > { %1886 = vmatmul.f32.gmra.mxu2 %v3102_v59 }
 0x16e   : > { %v1027_v58 = vpop.f32.mrf.mxu1 }
 0x16f   : > { %v942_v55 = vpop.f32.mrf.mxu0  ;;  %v1028_v60 = vadd.f32 %v1027_v58, %v939_v13  ;;  %v1387_v31 = vpop.f32.mrf.mxu2 }
 0x170   : > { %v1548_v32 = vpop.f32.mrf.mxu3  ;;  %v943_v59 = vadd.f32 %v942_v55, %v3176_v6 }
 0x171   : > { %v3369_v40 = vadd.f32 %v1548_v32, %v1387_v31  ;;  %2271 = vst.msk [vmem:[%s3312_s23 + $0x88] sm:$0xff] %vm1070_vm1, %v1028_v60  ;;  %1761 = vmatmul.f32.gmra.mxu1 %v3663_v23  ;;  %1108 = vrot.lane.b32.xlu2 %v1028_v60, %s2571_s25 }
 0x172   : > { %1655 = vmatmul.f32.gmra.mxu0 %v3132_v39  ;;  %v3665_v39 = vand.u32 4294901760, %v3149_v61 }
 0x173   : > { %1979 = vmatmul.f32.gmra.mxu3 %v3119_v53 }
 0x174   : > { %1890 = vmatmul.f32.gmra.mxu2 %v3119_v53 }
 0x176   : > { %v1031_v38 = vpop.f32.mrf.mxu1 }
 0x177   : > { %v946_v52 = vpop.f32.mrf.mxu0  ;;  %v1032_v2 = vadd.f32 %v1031_v38, %v943_v59  ;;  %v1395_v14 = vpop.f32.mrf.mxu2  ;;  %v2132_v59 = vld [vmem:[%s265_s29 + $0x8] sm:$0xff]  ;;  %v2134_v38 = vld [vmem:[%s265_s29 + $0x18] sm:$0xff] }
 0x178   : > { %v1552_v25 = vpop.f32.mrf.mxu3  ;;  %v947_v53 = vadd.f32 %v946_v52, %v3193_v57  ;;  %v2133_v52 = vld [vmem:[%s265_s29 + $0x10] sm:$0xff]  ;;  %2362 = vst.msk [vmem:[%s3312_s23 + $0x208] sm:$0xff] %vm1070_vm1, %v2132_v59 }
 0x179   : > { %v3380_v5 = vadd.f32 %v1552_v25, %v1395_v14  ;;  %2272 = vst.msk [vmem:[%s3312_s23 + $0xc0] sm:$0xff] %vm1070_vm1, %v1032_v2  ;;  %1767 = vmatmul.f32.gmra.mxu1 %v3664_v43  ;;  %1117 = vrot.lane.b32.xlu0 %v1032_v2, %s2571_s25 }
 0x17a   : > { %1660 = vmatmul.f32.gmra.mxu0 %v3149_v61  ;;  %v3666_v61 = vand.u32 4294901760, %v3166_v24  ;;  %2363 = vst.msk [vmem:[%s3312_s23 + $0x210] sm:$0xff] %vm1070_vm1, %v2133_v52 }
 0x17b   : > { %1983 = vmatmul.f32.gmra.mxu3 %v3136_v29  ;;  %2364 = vst.msk [vmem:[%s3312_s23 + $0x218] sm:$0xff] %vm1070_vm1, %v2134_v38 }
 0x17c   : > { %1894 = vmatmul.f32.gmra.mxu2 %v3136_v29 }
 0x17e   : > { %v1035_v54 = vpop.f32.mrf.mxu1 }
 0x17f   : > { %v950_v6 = vpop.f32.mrf.mxu0  ;;  %v1036_v7 = vadd.f32 %v1035_v54, %v947_v53  ;;  %v1403_v46 = vpop.f32.mrf.mxu2 }
 0x180   : > { %v1556_v8 = vpop.f32.mrf.mxu3  ;;  %v951_v29 = vadd.f32 %v950_v6, %v3210_v4 }
 0x181   : > { %v3391_v33 = vadd.f32 %v1556_v8, %v1403_v46  ;;  %2273 = vst.msk [vmem:[%s3312_s23 + $0xc8] sm:$0xff] %vm1070_vm1, %v1036_v7  ;;  %1773 = vmatmul.f32.gmra.mxu1 %v3665_v39  ;;  %1119 = vrot.lane.b32.xlu1 %v1036_v7, %s2571_s25 }
 0x182   : > { %1665 = vmatmul.f32.gmra.mxu0 %v3166_v24  ;;  %v3667_v24 = vand.u32 4294901760, %v3183_v63 }
 0x183   : > { %1987 = vmatmul.f32.gmra.mxu3 %v3153_v1 }
 0x184   : > { %1898 = vmatmul.f32.gmra.mxu2 %v3153_v1 }
 0x186   : > { %v1039_v44 = vpop.f32.mrf.mxu1 }
 0x187   : > { %v954_v57 = vpop.f32.mrf.mxu0  ;;  %v1040_v30 = vadd.f32 %v1039_v44, %v951_v29  ;;  %v1411_v62 = vpop.f32.mrf.mxu2 }
 0x188   : > { %v1560_v17 = vpop.f32.mrf.mxu3  ;;  %v955_v1 = vadd.f32 %v954_v57, %v3227_v18 }
 0x189   : > { %v3402_v48 = vadd.f32 %v1560_v17, %v1411_v62  ;;  %2282 = vst.msk [vmem:[%s3312_s23 + $0x20] sm:$0xff] %vm1070_vm1, %v1040_v30  ;;  %1779 = vmatmul.f32.gmra.mxu1 %v3666_v61  ;;  %1140 = vrot.lane.b32.xlu2 %v1040_v30, %s2571_s25 }
 0x18a   : > { %1670 = vmatmul.f32.gmra.mxu0 %v3183_v63 }
 0x18b   : > { %1991 = vmatmul.f32.gmra.mxu3 %v3170_v50 }
 0x18c   : > { %1902 = vmatmul.f32.gmra.mxu2 %v3170_v50 }
 0x18e   : > { %v1043_v47 = vpop.f32.mrf.mxu1 }
 0x18f   : > { %v958_v4 = vpop.f32.mrf.mxu0  ;;  %v1044_v26 = vadd.f32 %v1043_v47, %v955_v1  ;;  %v1419_v13 = vpop.f32.mrf.mxu2 }
 0x190   : > { %v1564_v55 = vpop.f32.mrf.mxu3  ;;  %v959_v50 = vadd.f32 %v958_v4, %v3244_v28  ;;  %v2131_v28 = vld [vmem:[%s265_s29] sm:$0xff] }
 0x191   : > { %v3413_v58 = vadd.f32 %v1564_v55, %v1419_v13  ;;  %2283 = vst.msk [vmem:[%s3312_s23 + $0x28] sm:$0xff] %vm1070_vm1, %v1044_v26  ;;  %1785 = vmatmul.f32.gmra.mxu1 %v3667_v24  ;;  %1142 = vrot.lane.b32.xlu0 %v1044_v26, %s2571_s25 }
 0x192   : > { %1675 = vmatmul.f32.gmra.mxu0 %v3200_v27  ;;  %2361 = vst.msk [vmem:[%s3312_s23 + $0x200] sm:$0xff] %vm1070_vm1, %v2131_v28 }
 0x193   : > { %1995 = vmatmul.f32.gmra.mxu3 %v3187_v41 }
 0x194   : > { %1906 = vmatmul.f32.gmra.mxu2 %v3187_v41  ;;  %v3668_v41 = vand.u32 4294901760, %v3200_v27 }
 0x196   : > { %v1047_v60 = vpop.f32.mrf.mxu1 }
 0x197   : > { %v962_v18 = vpop.f32.mrf.mxu0  ;;  %v1048_v31 = vadd.f32 %v1047_v60, %v959_v50  ;;  %v1427_v32 = vpop.f32.mrf.mxu2 }
 0x198   : > { %v1568_v23 = vpop.f32.mrf.mxu3  ;;  %v963_v2 = vadd.f32 %v962_v18, %v3259_v35 }
 0x199   : > { %v3428_v63 = vadd.f32 %v1568_v23, %v1427_v32  ;;  %2284 = vst.msk [vmem:[%s3312_s23 + $0x60] sm:$0xff] %vm1070_vm1, %v1048_v31  ;;  %1791 = vmatmul.f32.gmra.mxu1 %v3668_v41  ;;  %1151 = vrot.lane.b32.xlu1 %v1048_v31, %s2571_s25 }
 0x19a   : > { %1680 = vmatmul.f32.gmra.mxu0 %v3217_v12 }
 0x19b   : > { %1999 = vmatmul.f32.gmra.mxu3 %v3204_v0 }
 0x19c   : > { %1910 = vmatmul.f32.gmra.mxu2 %v3204_v0  ;;  %v3669_v0 = vand.u32 4294901760, %v3217_v12  ;;  %v3670_v12 = vand.u32 4294901760, %v3234_v36 }
 0x19e   : > { %v1051_v14 = vpop.f32.mrf.mxu1 }
 0x19f   : > { %v966_v27 = vpop.f32.mrf.mxu0  ;;  %v1052_v25 = vadd.f32 %v1051_v14, %v963_v2  ;;  %v1435_v43 = vpop.f32.mrf.mxu2 }
 0x1a0   : > { %v1572_v53 = vpop.f32.mrf.mxu3  ;;  %v967_v35 = vadd.f32 %v966_v27, %v3274_v22 }
 0x1a1   : > { %v3447_v6 = vadd.f32 %v1572_v53, %v1435_v43  ;;  %2285 = vst.msk [vmem:[%s3312_s23 + $0x68] sm:$0xff] %vm1070_vm1, %v1052_v25  ;;  %1797 = vmatmul.f32.gmra.mxu1 %v3669_v0  ;;  %1153 = vrot.lane.b32.xlu2 %v1052_v25, %s2571_s25 }
 0x1a2   : > { %1685 = vmatmul.f32.gmra.mxu0 %v3234_v36  ;;  %v3671_v36 = vand.u32 4294901760, %v3251_v19 }
 0x1a3   : > { %2003 = vmatmul.f32.gmra.mxu3 %v3221_v20 }
 0x1a4   : > { %1914 = vmatmul.f32.gmra.mxu2 %v3221_v20 }
 0x1a6   : > { %v1055_v7 = vpop.f32.mrf.mxu1 }
 0x1a7   : > { %v970_v54 = vpop.f32.mrf.mxu0  ;;  %v1056_v46 = vadd.f32 %v1055_v7, %v967_v35  ;;  %v1443_v8 = vpop.f32.mrf.mxu2 }
 0x1a8   : > { %v1576_v39 = vpop.f32.mrf.mxu3  ;;  %v971_v20 = vadd.f32 %v970_v54, %v3286_v49 }
 0x1a9   : > { %v3458_v29 = vadd.f32 %v1576_v39, %v1443_v8  ;;  %2286 = vst.msk [vmem:[%s3312_s23 + $0xa0] sm:$0xff] %vm1070_vm1, %v1056_v46  ;;  %1803 = vmatmul.f32.gmra.mxu1 %v3670_v12  ;;  %1162 = vrot.lane.b32.xlu0 %v1056_v46, %s2571_s25 }
 0x1aa   : > { %1690 = vmatmul.f32.gmra.mxu0 %v3251_v19  ;;  %v3672_v19 = vand.u32 4294901760, %v3266_v15 }
 0x1ab   : > { %2007 = vmatmul.f32.gmra.mxu3 %v3238_v42 }
 0x1ac   : > { %1918 = vmatmul.f32.gmra.mxu2 %v3238_v42 }
 0x1ae   : > { %v1059_v57 = vpop.f32.mrf.mxu1 }
 0x1af   : > { %v974_v22 = vpop.f32.mrf.mxu0  ;;  %v1060_v44 = vadd.f32 %v1059_v57, %v971_v20  ;;  %v1451_v30 = vpop.f32.mrf.mxu2 }
 0x1b0   : > { %v1580_v62 = vpop.f32.mrf.mxu3  ;;  %v975_v42 = vadd.f32 %v974_v22, %v3295_v3 }
 0x1b1   : > { %v3469_v17 = vadd.f32 %v1580_v62, %v1451_v30  ;;  %2287 = vst.msk [vmem:[%s3312_s23 + $0xa8] sm:$0xff] %vm1070_vm1, %v1060_v44  ;;  %1809 = vmatmul.f32.gmra.mxu1 %v3671_v36  ;;  %1164 = vrot.lane.b32.xlu1 %v1060_v44, %s2571_s25 }
 0x1b2   : > { %1695 = vmatmul.f32.gmra.mxu0 %v3266_v15 }
 0x1b3   : > { %2011 = vmatmul.f32.gmra.mxu3 %v3255_v56 }
 0x1b4   : > { %1922 = vmatmul.f32.gmra.mxu2 %v3255_v56 }
 0x1b6   : > { %v1063_v61 = vpop.f32.mrf.mxu1 }
 0x1b7   : > { %v978_v49 = vpop.f32.mrf.mxu0  ;;  %v1064_v1 = vadd.f32 %v1063_v61, %v975_v42  ;;  %v1459_v4 = vpop.f32.mrf.mxu2 }
 0x1b8   : > { %v1584_v47 = vpop.f32.mrf.mxu3  ;;  %v979_v3 = vadd.f32 %v978_v49, %v3304_v21 }
 0x1b9   : > { %v3480_v26 = vadd.f32 %v1584_v47, %v1459_v4  ;;  %2288 = vst.msk [vmem:[%s3312_s23 + $0xe0] sm:$0xff] %vm1070_vm1, %v1064_v1  ;;  %1815 = vmatmul.f32.gmra.mxu1 %v3672_v19  ;;  %1173 = vrot.lane.b32.xlu2 %v1064_v1, %s2571_s25 }
 0x1ba   : > { %1700 = vmatmul.f32.gmra.mxu0 %v3281_v37 }
 0x1bb   : > { %2015 = vmatmul.f32.gmra.mxu3 %v3270_v10  ;;  %v1085_v56 = vpop.permute.xlu0 %1084 }
 0x1bc   : > { %1926 = vmatmul.f32.gmra.mxu2 %v3270_v10  ;;  %2274 = vst.msk [vmem:[%s3312_s23 + $0x10] sm:$0xff] %vm1070_vm1, %v1085_v56 }
 0x1be   : > { %v1067_v13 = vpop.f32.mrf.mxu1 }
 0x1bf   : > { %v1626_v55 = vpop.f32.mrf.mxu0  ;;  %v1068_v24 = vadd.f32 %v1067_v13, %v979_v3  ;;  %v1467_v50 = vpop.f32.mrf.mxu2 }
 0x1c0   : > { %v1588_v18 = vpop.f32.mrf.mxu3  ;;  %v1627_v21 = vadd.f32 %v1626_v55, %v3314_v11 }
 0x1c1   : > { %v3493_v15 = vadd.f32 %v1588_v18, %v1467_v50  ;;  %2289 = vst.msk [vmem:[%s3312_s23 + $0xe8] sm:$0xff] %vm1070_vm1, %v1068_v24  ;;  %1821 = vmatmul.f32.gmra.mxu1 %v1463_v34  ;;  %1175 = vrot.lane.b32.xlu0 %v1068_v24, %s2571_s25 }
 0x1c3   : > { %v1107_v10 = vpop.permute.xlu2 %1106  ;;  %v1087_v60 = vpop.permute.xlu0 %1086 }
 0x1c4   : > { %2278 = vst.msk [vmem:[%s3312_s23 + $0x90] sm:$0xff] %vm1070_vm1, %v1107_v10 }
 0x1c5   : > { %2275 = vst.msk [vmem:[%s3312_s23 + $0x18] sm:$0xff] %vm1070_vm1, %v1087_v60 }
 0x1c6   : > { %v1732_v32 = vpop.f32.mrf.mxu1 }
 0x1c7   : > { %v1631_v31 = vpop.f32.mrf.mxu0  ;;  %v1733_v23 = vadd.f32 %v1732_v32, %v1627_v21  ;;  %v1867_v41 = vpop.f32.mrf.mxu2 }
 0x1c8   : > { %v1956_v28 = vpop.f32.mrf.mxu3  ;;  %v1632_v38 = vadd.f32 %v1631_v31, %v3325_v51 }
 0x1c9   : > { %v1868_v37 = vadd.f32 %v1867_v41, %v1733_v23 }
 0x1cb   : > { %v1957_v34 = vadd.f32 %v1956_v28, %v1868_v37  ;;  %v1109_v59 = vpop.permute.xlu2 %1108  ;;  %v1096_v52 = vpop.permute.xlu1 %1095 }
 0x1cc   : > { %2279 = vst.msk [vmem:[%s3312_s23 + $0x98] sm:$0xff] %vm1070_vm1, %v1109_v59 }
 0x1cd   : > { %2329 = vst.msk [vmem:[%s3312_s23 + $0x100] sm:$0xff] %vm1070_vm1, %v1957_v34  ;;  %2033 = vrot.lane.b32.xlu1 %v1957_v34, %s2571_s25 }
 0x1ce   : > { %v1738_v2 = vpop.f32.mrf.mxu1  ;;  %2276 = vst.msk [vmem:[%s3312_s23 + $0x50] sm:$0xff] %vm1070_vm1, %v1096_v52 }
 0x1cf   : > { %v1636_v11 = vpop.f32.mrf.mxu0  ;;  %v1739_v27 = vadd.f32 %v1738_v2, %v1632_v38  ;;  %v1871_v14 = vpop.f32.mrf.mxu2 }
 0x1d0   : > { %v1960_v25 = vpop.f32.mrf.mxu3  ;;  %v1637_v51 = vadd.f32 %v1636_v11, %v3336_v9 }
 0x1d1   : > { %v1872_v43 = vadd.f32 %v1871_v14, %v1739_v27 }
 0x1d3   : > { %v1961_v53 = vadd.f32 %v1960_v25, %v1872_v43  ;;  %v1098_v0 = vpop.permute.xlu1 %1097 }
 0x1d4   : > { %2277 = vst.msk [vmem:[%s3312_s23 + $0x58] sm:$0xff] %vm1070_vm1, %v1098_v0 }
 0x1d5   : > { %2330 = vst.msk [vmem:[%s3312_s23 + $0x108] sm:$0xff] %vm1070_vm1, %v1961_v53  ;;  %2035 = vrot.lane.b32.xlu2 %v1961_v53, %s2571_s25 }
 0x1d6   : > { %v1744_v54 = vpop.f32.mrf.mxu1 }
 0x1d7   : > { %v1641_v35 = vpop.f32.mrf.mxu0  ;;  %v1745_v7 = vadd.f32 %v1744_v54, %v1637_v51  ;;  %v1875_v46 = vpop.f32.mrf.mxu2 }
 0x1d8   : > { %v1964_v8 = vpop.f32.mrf.mxu3  ;;  %v1642_v20 = vadd.f32 %v1641_v35, %v3347_v16 }
 0x1d9   : > { %v1876_v39 = vadd.f32 %v1875_v46, %v1745_v7 }
 0x1db   : > { %v1965_v12 = vadd.f32 %v1964_v8, %v1876_v39 }
 0x1dd   : > { %2331 = vst.msk [vmem:[%s3312_s23 + $0x140] sm:$0xff] %vm1070_vm1, %v1965_v12  ;;  %2044 = vrot.lane.b32.xlu0 %v1965_v12, %s2571_s25 }
 0x1de   : > { %v1750_v22 = vpop.f32.mrf.mxu1 }
 0x1df   : > { %v1646_v9 = vpop.f32.mrf.mxu0  ;;  %v1751_v57 = vadd.f32 %v1750_v22, %v1642_v20  ;;  %v1879_v44 = vpop.f32.mrf.mxu2 }
 0x1e0   : > { %v1968_v30 = vpop.f32.mrf.mxu3  ;;  %v1647_v49 = vadd.f32 %v1646_v9, %v3358_v45 }
 0x1e1   : > { %v1880_v62 = vadd.f32 %v1879_v44, %v1751_v57 }
 0x1e3   : > { %v1969_v36 = vadd.f32 %v1968_v30, %v1880_v62  ;;  %v1141_v42 = vpop.permute.xlu2 %1140 }
 0x1e4   : > { %2290 = vst.msk [vmem:[%s3312_s23 + $0x30] sm:$0xff] %vm1070_vm1, %v1141_v42 }
 0x1e5   : > { %2332 = vst.msk [vmem:[%s3312_s23 + $0x148] sm:$0xff] %vm1070_vm1, %v1969_v36  ;;  %2046 = vrot.lane.b32.xlu1 %v1969_v36, %s2571_s25 }
 0x1e6   : > { %v1756_v61 = vpop.f32.mrf.mxu1 }
 0x1e7   : > { %v1651_v16 = vpop.f32.mrf.mxu0  ;;  %v1757_v1 = vadd.f32 %v1756_v61, %v1647_v49  ;;  %v1883_v4 = vpop.f32.mrf.mxu2 }
 0x1e8   : > { %v1972_v47 = vpop.f32.mrf.mxu3  ;;  %v1652_v13 = vadd.f32 %v1651_v16, %v3369_v40 }
 0x1e9   : > { %v1884_v19 = vadd.f32 %v1883_v4, %v1757_v1 }
 0x1eb   : > { %v1973_v56 = vadd.f32 %v1972_v47, %v1884_v19  ;;  %v1118_v3 = vpop.permute.xlu0 %1117 }
 0x1ec   : > { %2280 = vst.msk [vmem:[%s3312_s23 + $0xd0] sm:$0xff] %vm1070_vm1, %v1118_v3 }
 0x1ed   : > { %2333 = vst.msk [vmem:[%s3312_s23 + $0x180] sm:$0xff] %vm1070_vm1, %v1973_v56  ;;  %2055 = vrot.lane.b32.xlu2 %v1973_v56, %s2571_s25 }
 0x1ee   : > { %v1762_v55 = vpop.f32.mrf.mxu1 }
 0x1ef   : > { %v1656_v45 = vpop.f32.mrf.mxu0  ;;  %v1763_v24 = vadd.f32 %v1762_v55, %v1652_v13  ;;  %v1887_v50 = vpop.f32.mrf.mxu2 }
 0x1f0   : > { %v1976_v18 = vpop.f32.mrf.mxu3  ;;  %v1657_v31 = vadd.f32 %v1656_v45, %v3380_v5 }
 0x1f1   : > { %v1888_v10 = vadd.f32 %v1887_v50, %v1763_v24 }
 0x1f3   : > { %v1977_v60 = vadd.f32 %v1976_v18, %v1888_v10  ;;  %v1120_v21 = vpop.permute.xlu1 %1119 }
 0x1f4   : > { %2281 = vst.msk [vmem:[%s3312_s23 + $0xd8] sm:$0xff] %vm1070_vm1, %v1120_v21 }
 0x1f5   : > { %2334 = vst.msk [vmem:[%s3312_s23 + $0x188] sm:$0xff] %vm1070_vm1, %v1977_v60  ;;  %2057 = vrot.lane.b32.xlu0 %v1977_v60, %s2571_s25 }
 0x1f6   : > { %v1768_v32 = vpop.f32.mrf.mxu1 }
 0x1f7   : > { %v1661_v40 = vpop.f32.mrf.mxu0  ;;  %v1769_v23 = vadd.f32 %v1768_v32, %v1657_v31  ;;  %v1891_v41 = vpop.f32.mrf.mxu2 }
 0x1f8   : > { %v1980_v28 = vpop.f32.mrf.mxu3  ;;  %v1662_v52 = vadd.f32 %v1661_v40, %v3391_v33 }
 0x1f9   : > { %v1892_v37 = vadd.f32 %v1891_v41, %v1769_v23 }
 0x1fb   : > { %v1981_v34 = vadd.f32 %v1980_v28, %v1892_v37  ;;  %v1154_v59 = vpop.permute.xlu2 %1153 }
 0x1fc   : > { %2293 = vst.msk [vmem:[%s3312_s23 + $0x78] sm:$0xff] %vm1070_vm1, %v1154_v59 }
 0x1fd   : > { %2335 = vst.msk [vmem:[%s3312_s23 + $0x1c0] sm:$0xff] %vm1070_vm1, %v1981_v34  ;;  %2066 = vrot.lane.b32.xlu1 %v1981_v34, %s2571_s25 }
 0x1fe   : > { %v1774_v38 = vpop.f32.mrf.mxu1 }
 0x1ff   : > { %v1666_v5 = vpop.f32.mrf.mxu0  ;;  %v1775_v11 = vadd.f32 %v1774_v38, %v1662_v52  ;;  %v1895_v2 = vpop.f32.mrf.mxu2 }
 0x200   : > { %v1984_v27 = vpop.f32.mrf.mxu3  ;;  %v1667_v53 = vadd.f32 %v1666_v5, %v3402_v48 }
 0x201   : > { %v1896_v14 = vadd.f32 %v1895_v2, %v1775_v11 }
 0x203   : > { %v1985_v25 = vadd.f32 %v1984_v27, %v1896_v14  ;;  %v1143_v43 = vpop.permute.xlu0 %1142 }
 0x204   : > { %2291 = vst.msk [vmem:[%s3312_s23 + $0x38] sm:$0xff] %vm1070_vm1, %v1143_v43 }
 0x205   : > { %2336 = vst.msk [vmem:[%s3312_s23 + $0x1c8] sm:$0xff] %vm1070_vm1, %v1985_v25  ;;  %2068 = vrot.lane.b32.xlu2 %v1985_v25, %s2571_s25 }
 0x206   : > { %v1780_v0 = vpop.f32.mrf.mxu1 }
 0x207   : > { %v1671_v33 = vpop.f32.mrf.mxu0  ;;  %v1781_v51 = vadd.f32 %v1780_v0, %v1667_v53  ;;  %v1899_v35 = vpop.f32.mrf.mxu2 }
 0x208   : > { %v1988_v54 = vpop.f32.mrf.mxu3  ;;  %v1672_v39 = vadd.f32 %v1671_v33, %v3413_v58 }
 0x209   : > { %v1900_v7 = vadd.f32 %v1899_v35, %v1781_v51 }
 0x20b   : > { %v1989_v46 = vadd.f32 %v1988_v54, %v1900_v7  ;;  %v1152_v8 = vpop.permute.xlu1 %1151 }
 0x20c   : > { %2292 = vst.msk [vmem:[%s3312_s23 + $0x70] sm:$0xff] %vm1070_vm1, %v1152_v8 }
 0x20d   : > { %2345 = vst.msk [vmem:[%s3312_s23 + $0x120] sm:$0xff] %vm1070_vm1, %v1989_v46  ;;  %2089 = vrot.lane.b32.xlu0 %v1989_v46, %s2571_s25 }
 0x20e   : > { %v1786_v12 = vpop.f32.mrf.mxu1 }
 0x20f   : > { %v1676_v48 = vpop.f32.mrf.mxu0  ;;  %v1787_v20 = vadd.f32 %v1786_v12, %v1672_v39  ;;  %v1903_v9 = vpop.f32.mrf.mxu2 }
 0x210   : > { %v1992_v22 = vpop.f32.mrf.mxu3  ;;  %v1677_v62 = vadd.f32 %v1676_v48, %v3428_v63 }
 0x211   : > { %v1904_v57 = vadd.f32 %v1903_v9, %v1787_v20 }
 0x213   : > { %v1993_v44 = vadd.f32 %v1992_v22, %v1904_v57  ;;  %v1174_v30 = vpop.permute.xlu2 %1173 }
 0x214   : > { %2296 = vst.msk [vmem:[%s3312_s23 + $0xf0] sm:$0xff] %vm1070_vm1, %v1174_v30 }
 0x215   : > { %2346 = vst.msk [vmem:[%s3312_s23 + $0x128] sm:$0xff] %vm1070_vm1, %v1993_v44  ;;  %2091 = vrot.lane.b32.xlu1 %v1993_v44, %s2571_s25 }
 0x216   : > { %v1792_v36 = vpop.f32.mrf.mxu1 }
 0x217   : > { %v1681_v58 = vpop.f32.mrf.mxu0  ;;  %v1793_v42 = vadd.f32 %v1792_v36, %v1677_v62  ;;  %v1907_v49 = vpop.f32.mrf.mxu2 }
 0x218   : > { %v1996_v16 = vpop.f32.mrf.mxu3  ;;  %v1682_v47 = vadd.f32 %v1681_v58, %v3447_v6 }
 0x219   : > { %v1908_v61 = vadd.f32 %v1907_v49, %v1793_v42 }
 0x21b   : > { %v1997_v1 = vadd.f32 %v1996_v16, %v1908_v61  ;;  %v1163_v4 = vpop.permute.xlu0 %1162 }
 0x21c   : > { %2294 = vst.msk [vmem:[%s3312_s23 + $0xb0] sm:$0xff] %vm1070_vm1, %v1163_v4 }
 0x21d   : > { %2347 = vst.msk [vmem:[%s3312_s23 + $0x160] sm:$0xff] %vm1070_vm1, %v1997_v1  ;;  %2100 = vrot.lane.b32.xlu2 %v1997_v1, %s2571_s25 }
 0x21e   : > { %v1798_v19 = vpop.f32.mrf.mxu1 }
 0x21f   : > { %v1686_v63 = vpop.f32.mrf.mxu0  ;;  %v1799_v56 = vadd.f32 %v1798_v19, %v1682_v47  ;;  %v1911_v3 = vpop.f32.mrf.mxu2 }
 0x220   : > { %v2000_v13 = vpop.f32.mrf.mxu3  ;;  %v1687_v50 = vadd.f32 %v1686_v63, %v3458_v29 }
 0x221   : > { %v1912_v45 = vadd.f32 %v1911_v3, %v1799_v56 }
 0x223   : > { %v2001_v55 = vadd.f32 %v2000_v13, %v1912_v45  ;;  %v1165_v24 = vpop.permute.xlu1 %1164 }
 0x224   : > { %2295 = vst.msk [vmem:[%s3312_s23 + $0xb8] sm:$0xff] %vm1070_vm1, %v1165_v24 }
 0x225   : > { %2348 = vst.msk [vmem:[%s3312_s23 + $0x168] sm:$0xff] %vm1070_vm1, %v2001_v55  ;;  %2102 = vrot.lane.b32.xlu0 %v2001_v55, %s2571_s25 }
 0x226   : > { %v1804_v18 = vpop.f32.mrf.mxu1 }
 0x227   : > { %v1691_v6 = vpop.f32.mrf.mxu0  ;;  %v1805_v10 = vadd.f32 %v1804_v18, %v1687_v50  ;;  %v1915_v60 = vpop.f32.mrf.mxu2 }
 0x228   : > { %v2004_v21 = vpop.f32.mrf.mxu3  ;;  %v1692_v32 = vadd.f32 %v1691_v6, %v3469_v17 }
 0x229   : > { %v1916_v31 = vadd.f32 %v1915_v60, %v1805_v10 }
 0x22b   : > { %v2005_v40 = vadd.f32 %v2004_v21, %v1916_v31 }
 0x22d   : > { %2349 = vst.msk [vmem:[%s3312_s23 + $0x1a0] sm:$0xff] %vm1070_vm1, %v2005_v40  ;;  %2111 = vrot.lane.b32.xlu1 %v2005_v40, %s2571_s25 }
 0x22e   : > { %v1810_v29 = vpop.f32.mrf.mxu1 }
 0x22f   : > { %v1811_v23 = vadd.f32 %v1810_v29, %v1692_v32  ;;  %v2036_v41 = vpop.permute.xlu2 %2035  ;;  %v1919_v28 = vpop.f32.mrf.mxu2 }
 0x230   : > { %v1696_v37 = vpop.f32.mrf.mxu0  ;;  %2338 = vst.msk [vmem:[%s3312_s23 + $0x118] sm:$0xff] %vm1070_vm1, %v2036_v41  ;;  %v2008_v34 = vpop.f32.mrf.mxu3 }
 0x231   : > { %v1920_v59 = vadd.f32 %v1919_v28, %v1811_v23  ;;  %v1697_v17 = vadd.f32 %v1696_v37, %v3480_v26 }
 0x233   : > { %v2009_v52 = vadd.f32 %v2008_v34, %v1920_v59  ;;  %v1176_v5 = vpop.permute.xlu0 %1175 }
 0x234   : > { %2297 = vst.msk [vmem:[%s3312_s23 + $0xf8] sm:$0xff] %vm1070_vm1, %v1176_v5 }
 0x235   : > { %2350 = vst.msk [vmem:[%s3312_s23 + $0x1a8] sm:$0xff] %vm1070_vm1, %v2009_v52  ;;  %2113 = vrot.lane.b32.xlu2 %v2009_v52, %s2571_s25 }
 0x236   : > { %v1816_v38 = vpop.f32.mrf.mxu1 }
 0x237   : > { %v1817_v11 = vadd.f32 %v1816_v38, %v1697_v17  ;;  %v1923_v2 = vpop.f32.mrf.mxu2 }
 0x238   : > { %v2012_v27 = vpop.f32.mrf.mxu3  ;;  %v1701_v25 = vpop.f32.mrf.mxu0 }
 0x239   : > { %v1924_v14 = vadd.f32 %v1923_v2, %v1817_v11  ;;  %v1702_v53 = vadd.f32 %v1701_v25, %v3493_v15 }
 0x23b   : > { %v2013_v43 = vadd.f32 %v2012_v27, %v1924_v14 }
 0x23d   : > { %2351 = vst.msk [vmem:[%s3312_s23 + $0x1e0] sm:$0xff] %vm1070_vm1, %v2013_v43  ;;  %2122 = vrot.lane.b32.xlu0 %v2013_v43, %s2571_s25 }
 0x23e   : > { %v1822_v26 = vpop.f32.mrf.mxu1 }
 0x23f   : > { %v1823_v33 = vadd.f32 %v1822_v26, %v1702_v53  ;;  %v2034_v0 = vpop.permute.xlu1 %2033  ;;  %v1927_v51 = vpop.f32.mrf.mxu2 }
 0x240   : > { %2337 = vst.msk [vmem:[%s3312_s23 + $0x110] sm:$0xff] %vm1070_vm1, %v2034_v0  ;;  %v2016_v35 = vpop.f32.mrf.mxu3 }
 0x241   : > { %v1928_v54 = vadd.f32 %v1927_v51, %v1823_v33 }
 0x243   : > { %v2017_v7 = vadd.f32 %v2016_v35, %v1928_v54 }
 0x245   : > { %2352 = vst.msk [vmem:[%s3312_s23 + $0x1e8] sm:$0xff] %vm1070_vm1, %v2017_v7  ;;  %2124 = vrot.lane.b32.xlu1 %v2017_v7, %s2571_s25 }
 0x247   : > { %v2056_v15 = vpop.permute.xlu2 %2055 }
 0x248   : > { %2341 = vst.msk [vmem:[%s3312_s23 + $0x190] sm:$0xff] %vm1070_vm1, %v2056_v15 }
 0x24f   : > { %v2045_v46 = vpop.permute.xlu0 %2044 }
 0x250   : > { %2339 = vst.msk [vmem:[%s3312_s23 + $0x150] sm:$0xff] %vm1070_vm1, %v2045_v46 }
 0x257   : > { %v2047_v8 = vpop.permute.xlu1 %2046 }
 0x258   : > { %2340 = vst.msk [vmem:[%s3312_s23 + $0x158] sm:$0xff] %vm1070_vm1, %v2047_v8 }
 0x25f   : > { %v2069_v39 = vpop.permute.xlu2 %2068 }
 0x260   : > { %2344 = vst.msk [vmem:[%s3312_s23 + $0x1d8] sm:$0xff] %vm1070_vm1, %v2069_v39 }
 0x267   : > { %v2058_v48 = vpop.permute.xlu0 %2057 }
 0x268   : > { %2342 = vst.msk [vmem:[%s3312_s23 + $0x198] sm:$0xff] %vm1070_vm1, %v2058_v48 }
 0x26f   : > { %v2067_v12 = vpop.permute.xlu1 %2066 }
 0x270   : > { %2343 = vst.msk [vmem:[%s3312_s23 + $0x1d0] sm:$0xff] %vm1070_vm1, %v2067_v12 }
 0x277   : > { %v2101_v20 = vpop.permute.xlu2 %2100 }
 0x278   : > { %2355 = vst.msk [vmem:[%s3312_s23 + $0x170] sm:$0xff] %vm1070_vm1, %v2101_v20 }
 0x27f   : > { %v2090_v9 = vpop.permute.xlu0 %2089 }
 0x280   : > { %2353 = vst.msk [vmem:[%s3312_s23 + $0x130] sm:$0xff] %vm1070_vm1, %v2090_v9 }
 0x287   : > { %v2092_v22 = vpop.permute.xlu1 %2091 }
 0x288   : > { %2354 = vst.msk [vmem:[%s3312_s23 + $0x138] sm:$0xff] %vm1070_vm1, %v2092_v22 }
 0x28f   : > { %v2114_v57 = vpop.permute.xlu2 %2113 }
 0x290   : > { %2358 = vst.msk [vmem:[%s3312_s23 + $0x1b8] sm:$0xff] %vm1070_vm1, %v2114_v57 }
 0x297   : > { %v2103_v44 = vpop.permute.xlu0 %2102 }
 0x298   : > { %2356 = vst.msk [vmem:[%s3312_s23 + $0x178] sm:$0xff] %vm1070_vm1, %v2103_v44 }
 0x29f   : > { %v2112_v30 = vpop.permute.xlu1 %2111 }
 0x2a0   : > { %2357 = vst.msk [vmem:[%s3312_s23 + $0x1b0] sm:$0xff] %vm1070_vm1, %v2112_v30 }
 0x2af   : > { %v2123_v62 = vpop.permute.xlu0 %2122 }
 0x2b0   : > { %2359 = vst.msk [vmem:[%s3312_s23 + $0x1f0] sm:$0xff] %vm1070_vm1, %v2123_v62 }
 0x2b7   : > { %v2125_v58 = vpop.permute.xlu1 %2124 }
 0x2b8   : > { %2360 = vst.msk [vmem:[%s3312_s23 + $0x1f8] sm:$0xff] %vm1070_vm1, %v2125_v58 }
 0x2b9 PF: > { %p13_p4 = scmp.ge.s32.totalorder %s2649_s8, 8   ;;  %s3673_s15 = smov %s2557_s16 }
 0x2ba   : > { %s3674_s16 = smov %s2561_s17  ;;  %s3675_s17 = smov %s2660_s12 }
 0x2bb   : > { %s3676_s18 = smov %s2649_s8  ;;  %15 = sbr.rel (!%p13_p4) target bundleno = 3 (0x3), region = 157 }
 0x2c0   :  { %2161 = vsyncpa [#allocation3], 1 }
 0x2c1   :  { %2163 = vsyncpa [#allocation3 + $0x1], 1 }
 0x2c2   :  { %2164 = vsyncpa [#allocation5], 1 }

</bundles_post_ra>
